<compile_context>
chip_gen: v6e
topology: v6e:2x2x1
jax: 0.10.0
libtpu: 0.0.40
codegen_flags: <defaults>
</compile_context>

<pallas_src>
import functools

import jax
import jax.numpy as jnp
from jax.experimental import pallas as pl
from jax.experimental.pallas import tpu as pltpu


def _round_up(x: int, m: int) -> int:
    return (x + m - 1) // m * m


def _leaky_relu(x, slope=0.1):
    return jnp.where(x > 0, x, x * jnp.asarray(slope, x.dtype))


def mlp_kernel(x_ref,
               w1_ref, b1_ref,
               w2_ref, b2_ref,
               w3_ref, b3_ref,
               w4_ref, b4_ref,
               o_ref,
               *, with_softmax: bool):
    # x / weights are bf16 -> full-rate MXU matmuls with f32 accumulation.
    h = x_ref[...]

    for w_ref, b_ref in ((w1_ref, b1_ref), (w2_ref, b2_ref), (w3_ref, b3_ref)):
        a = jnp.dot(h, w_ref[...], preferred_element_type=jnp.float32) + b_ref[...]
        # Keep the stored activation bf16: halves vreg/VMEM footprint and feeds
        # the next MXU dot directly.
        h = _leaky_relu(a.astype(jnp.bfloat16))

    logits = jnp.dot(h, w4_ref[...],
                     preferred_element_type=jnp.float32) + b4_ref[...]

    if with_softmax:
        m = jnp.max(logits, axis=-1, keepdims=True)
        e = jnp.exp(logits - m)
        out = e / jnp.sum(e, axis=-1, keepdims=True)
    else:
        out = logits

    o_ref[...] = out.astype(o_ref.dtype)


def mlp_forward(x, params, *, with_softmax: bool = True, tile_b: int = 1024):
    """x: (B, input_dim) float32.  params: dict of f32 weights/biases
    (w_i: (fan_in, fan_out), b_i: (1, fan_out))."""
    B, in_dim = x.shape
    out_dim = params["w4"].shape[1]

    # Batch tile: aim for ~2 grid steps (one per v7x TensorCore), capped at
    # tile_b rows; rounded to 16 rows (bf16 sublane tile).  On 1-TC chips the
    # extra serial step is ~0.35us of overhead, negligible.
    tb = max(16, min(tile_b, _round_up(-(-B // 2), 16)))
    b_pad = _round_up(B, tb)
    if b_pad != B:
        x = jnp.pad(x, ((0, b_pad - B), (0, 0)))
    n_b = b_pad // tb

    # bf16 matmul inputs (half the DMA bytes, full MXU rate); f32 biases.
    x_bf = x.astype(jnp.bfloat16)
    w1 = params["w1"].astype(jnp.bfloat16)
    w2 = params["w2"].astype(jnp.bfloat16)
    w3 = params["w3"].astype(jnp.bfloat16)
    w4 = params["w4"].astype(jnp.bfloat16)
    b1, b2, b3, b4 = params["b1"], params["b2"], params["b3"], params["b4"]

    def full(shape):
        # Constant block index -> DMA'd once; single buffer is enough.
        return pl.BlockSpec(shape, lambda i: (0,) * len(shape),
                            pipeline_mode=pl.Buffered(1))

    kernel = functools.partial(mlp_kernel, with_softmax=with_softmax)

    flops = 2 * b_pad * (in_dim * 512 + 512 * 64 + 64 * 16 + 16 * out_dim)
    transcendentals = b_pad * out_dim if with_softmax else 0
    bytes_accessed = (x_bf.size * 2
                      + 2 * (w1.size + w2.size + w3.size + w4.size)
                      + 4 * (b1.size + b2.size + b3.size + b4.size)
                      + 4 * b_pad * out_dim)
    cost = pl.CostEstimate(flops=flops, transcendentals=transcendentals,
                           bytes_accessed=bytes_accessed)

    out = pl.pallas_call(
        kernel,
        out_shape=jax.ShapeDtypeStruct((b_pad, out_dim), jnp.float32),
        grid_spec=pltpu.PrefetchScalarGridSpec(
            num_scalar_prefetch=0,
            grid=(n_b,),
            in_specs=[
                pl.BlockSpec((tb, in_dim), lambda i: (i, 0)),
                full(w1.shape), full(b1.shape),
                full(w2.shape), full(b2.shape),
                full(w3.shape), full(b3.shape),
                full(w4.shape), full(b4.shape),
            ],
            # Block last dim == full array dim, so the (8,128) rule is
            # satisfied and the HBM writeback is only out_dim lanes wide.
            out_specs=pl.BlockSpec((tb, out_dim), lambda i: (i, 0)),
        ),
        compiler_params=pltpu.CompilerParams(
            dimension_semantics=("parallel",)),
        cost_estimate=cost,
    )(x_bf, w1, b1, w2, b2, w3, b3, w4, b4)

    return out[:B]


def init_mlp_params(key, input_dim, output_dim):
    """Deterministic init mimicking PyTorch Linear default U(-1/sqrt(fan_in), +)."""
    dims = [(input_dim, 512), (512, 64), (64, 16), (16, output_dim)]
    params = {}
    for idx, (fan_in, fan_out) in enumerate(dims, start=1):
        key, kw, kb = jax.random.split(key, 3)
        bound = 1.0 / jnp.sqrt(float(fan_in))
        params[f"w{idx}"] = jax.random.uniform(
            kw, (fan_in, fan_out), jnp.float32, -bound, bound)
        params[f"b{idx}"] = jax.random.uniform(
            kb, (1, fan_out), jnp.float32, -bound, bound)
    return params


def mlp_reference(x, params, with_softmax=True):
    # Mirrors the kernel math: bf16 matmul inputs, f32 accumulation,
    # bf16 LeakyReLU activations, f32 softmax.
    h = x.astype(jnp.bfloat16)
    for i in range(1, 4):
        a = jnp.dot(h, params[f"w{i}"].astype(jnp.bfloat16),
                    preferred_element_type=jnp.float32) + params[f"b{i}"]
        a = a.astype(jnp.bfloat16)
        h = jnp.where(a > 0, a, a * jnp.asarray(0.1, a.dtype))
    logits = jnp.dot(h, params["w4"].astype(jnp.bfloat16),
                     preferred_element_type=jnp.float32) + params["b4"]
    if with_softmax:
        return jax.nn.softmax(logits, axis=-1)
    return logits


if __name__ == "__main__":
    key = jax.random.PRNGKey(0)
    kx, kp = jax.random.split(key)

    input_dim, output_dim, batch = 32, 4, 512   # tb=256 -> grid=(2,), one per v7x TC
    x = jax.random.normal(kx, (batch, input_dim), jnp.float32)
    params = init_mlp_params(kp, input_dim, output_dim)

    out = mlp_forward(x, params, with_softmax=True)
    out = jax.block_until_ready(out)

    ref = mlp_reference(x, params, with_softmax=True)
    assert out.shape == (batch, output_dim)
    assert jnp.allclose(out, ref, atol=5e-3, rtol=5e-3), "mismatch vs reference"
    assert jnp.allclose(jnp.sum(out, axis=-1), 1.0, atol=1e-3), \
        "softmax rows must sum to 1"

    print("KERNEL_OK")
</pallas_src>

<mosaic_0001>
module attributes {stable_mosaic.version = 11 : i64} {
  func.func @mlp_kernel(%arg0: i32, %arg1: memref<256x32xbf16, #tpu.memory_space<vmem>>, %arg2: memref<32x512xbf16, #tpu.memory_space<vmem>>, %arg3: memref<1x512xf32, #tpu.memory_space<vmem>>, %arg4: memref<512x64xbf16, #tpu.memory_space<vmem>>, %arg5: memref<1x64xf32, #tpu.memory_space<vmem>>, %arg6: memref<64x16xbf16, #tpu.memory_space<vmem>>, %arg7: memref<1x16xf32, #tpu.memory_space<vmem>>, %arg8: memref<16x4xbf16, #tpu.memory_space<vmem>>, %arg9: memref<1x4xf32, #tpu.memory_space<vmem>>, %arg10: memref<256x4xf32, #tpu.memory_space<vmem>>) attributes {dimension_semantics = [#tpu.dimension_semantics<parallel>], iteration_bounds = array<i64: 2>, scalar_prefetch = 0 : i64, scratch_operands = 0 : i64, tpu.core_type = #tpu.core_type<tc>, window_params = [{transform_indices = @transform_0, window_bounds = array<i64: 256, 32>}, {pipeline_mode = #tpu.pipeline_mode<synchronous>, transform_indices = @transform_1, window_bounds = array<i64: 32, 512>}, {pipeline_mode = #tpu.pipeline_mode<synchronous>, transform_indices = @transform_2, window_bounds = array<i64: 1, 512>}, {pipeline_mode = #tpu.pipeline_mode<synchronous>, transform_indices = @transform_3, window_bounds = array<i64: 512, 64>}, {pipeline_mode = #tpu.pipeline_mode<synchronous>, transform_indices = @transform_4, window_bounds = array<i64: 1, 64>}, {pipeline_mode = #tpu.pipeline_mode<synchronous>, transform_indices = @transform_5, window_bounds = array<i64: 64, 16>}, {pipeline_mode = #tpu.pipeline_mode<synchronous>, transform_indices = @transform_6, window_bounds = array<i64: 1, 16>}, {pipeline_mode = #tpu.pipeline_mode<synchronous>, transform_indices = @transform_7, window_bounds = array<i64: 16, 4>}, {pipeline_mode = #tpu.pipeline_mode<synchronous>, transform_indices = @transform_8, window_bounds = array<i64: 1, 4>}, {transform_indices = @transform_9, window_bounds = array<i64: 256, 4>}]} {
    %c0 = arith.constant 0 : index
    %c0_0 = arith.constant 0 : index
    %0 = vector.load %arg1[%c0, %c0_0] : memref<256x32xbf16, #tpu.memory_space<vmem>>, vector<256x32xbf16>
    %c0_1 = arith.constant 0 : index
    %c0_2 = arith.constant 0 : index
    %1 = vector.load %arg2[%c0_1, %c0_2] : memref<32x512xbf16, #tpu.memory_space<vmem>>, vector<32x512xbf16>
    %cst = arith.constant dense<0.000000e+00> : vector<256x512xf32>
    %2 = tpu.matmul %0, %1, %cst {dimension_numbers = #tpu.dot_dimension_numbers<[1], [0], [0], [1], [0, 0, 1, 1], [], []>} : vector<256x32xbf16>, vector<32x512xbf16>, vector<256x512xf32> -> vector<256x512xf32>
    %c0_3 = arith.constant 0 : index
    %c0_4 = arith.constant 0 : index
    %3 = vector.load %arg3[%c0_3, %c0_4] : memref<1x512xf32, #tpu.memory_space<vmem>>, vector<1x512xf32>
    %4 = vector.broadcast %3 : vector<1x512xf32> to vector<256x512xf32>
    %5 = arith.addf %2, %4 : vector<256x512xf32>
    %6 = arith.truncf %5 : vector<256x512xf32> to vector<256x512xbf16>
    %cst_5 = arith.constant 0.000000e+00 : bf16
    %7 = vector.broadcast %cst_5 : bf16 to vector<256x512xbf16>
    %8 = arith.cmpf ogt, %6, %7 : vector<256x512xbf16>
    %cst_6 = arith.constant 1.000980e-01 : bf16
    %9 = vector.broadcast %cst_6 : bf16 to vector<256x512xbf16>
    %10 = arith.mulf %6, %9 : vector<256x512xbf16>
    %11 = arith.select %8, %6, %10 : vector<256x512xi1>, vector<256x512xbf16>
    %c0_7 = arith.constant 0 : index
    %c0_8 = arith.constant 0 : index
    %12 = vector.load %arg4[%c0_7, %c0_8] : memref<512x64xbf16, #tpu.memory_space<vmem>>, vector<512x64xbf16>
    %cst_9 = arith.constant dense<0.000000e+00> : vector<256x64xf32>
    %13 = tpu.matmul %11, %12, %cst_9 {dimension_numbers = #tpu.dot_dimension_numbers<[1], [0], [0], [1], [0, 0, 1, 1], [], []>} : vector<256x512xbf16>, vector<512x64xbf16>, vector<256x64xf32> -> vector<256x64xf32>
    %c0_10 = arith.constant 0 : index
    %c0_11 = arith.constant 0 : index
    %14 = vector.load %arg5[%c0_10, %c0_11] : memref<1x64xf32, #tpu.memory_space<vmem>>, vector<1x64xf32>
    %15 = vector.broadcast %14 : vector<1x64xf32> to vector<256x64xf32>
    %16 = arith.addf %13, %15 : vector<256x64xf32>
    %17 = arith.truncf %16 : vector<256x64xf32> to vector<256x64xbf16>
    %cst_12 = arith.constant 0.000000e+00 : bf16
    %18 = vector.broadcast %cst_12 : bf16 to vector<256x64xbf16>
    %19 = arith.cmpf ogt, %17, %18 : vector<256x64xbf16>
    %cst_13 = arith.constant 1.000980e-01 : bf16
    %20 = vector.broadcast %cst_13 : bf16 to vector<256x64xbf16>
    %21 = arith.mulf %17, %20 : vector<256x64xbf16>
    %22 = arith.select %19, %17, %21 : vector<256x64xi1>, vector<256x64xbf16>
    %c0_14 = arith.constant 0 : index
    %c0_15 = arith.constant 0 : index
    %23 = vector.load %arg6[%c0_14, %c0_15] : memref<64x16xbf16, #tpu.memory_space<vmem>>, vector<64x16xbf16>
    %cst_16 = arith.constant dense<0.000000e+00> : vector<256x16xf32>
    %24 = tpu.matmul %22, %23, %cst_16 {dimension_numbers = #tpu.dot_dimension_numbers<[1], [0], [0], [1], [0, 0, 1, 1], [], []>} : vector<256x64xbf16>, vector<64x16xbf16>, vector<256x16xf32> -> vector<256x16xf32>
    %c0_17 = arith.constant 0 : index
    %c0_18 = arith.constant 0 : index
    %25 = vector.load %arg7[%c0_17, %c0_18] : memref<1x16xf32, #tpu.memory_space<vmem>>, vector<1x16xf32>
    %26 = vector.broadcast %25 : vector<1x16xf32> to vector<256x16xf32>
    %27 = arith.addf %24, %26 : vector<256x16xf32>
    %28 = arith.truncf %27 : vector<256x16xf32> to vector<256x16xbf16>
    %cst_19 = arith.constant 0.000000e+00 : bf16
    %29 = vector.broadcast %cst_19 : bf16 to vector<256x16xbf16>
    %30 = arith.cmpf ogt, %28, %29 : vector<256x16xbf16>
    %cst_20 = arith.constant 1.000980e-01 : bf16
    %31 = vector.broadcast %cst_20 : bf16 to vector<256x16xbf16>
    %32 = arith.mulf %28, %31 : vector<256x16xbf16>
    %33 = arith.select %30, %28, %32 : vector<256x16xi1>, vector<256x16xbf16>
    %c0_21 = arith.constant 0 : index
    %c0_22 = arith.constant 0 : index
    %34 = vector.load %arg8[%c0_21, %c0_22] : memref<16x4xbf16, #tpu.memory_space<vmem>>, vector<16x4xbf16>
    %cst_23 = arith.constant dense<0.000000e+00> : vector<256x4xf32>
    %35 = tpu.matmul %33, %34, %cst_23 {dimension_numbers = #tpu.dot_dimension_numbers<[1], [0], [0], [1], [0, 0, 1, 1], [], []>} : vector<256x16xbf16>, vector<16x4xbf16>, vector<256x4xf32> -> vector<256x4xf32>
    %c0_24 = arith.constant 0 : index
    %c0_25 = arith.constant 0 : index
    %36 = vector.load %arg9[%c0_24, %c0_25] : memref<1x4xf32, #tpu.memory_space<vmem>>, vector<1x4xf32>
    %37 = vector.broadcast %36 : vector<1x4xf32> to vector<256x4xf32>
    %38 = arith.addf %35, %37 : vector<256x4xf32>
    %cst_26 = arith.constant dense<0xFF800000> : vector<256xf32>
    %39 = vector.multi_reduction <maximumf>, %38, %cst_26 [1] : vector<256x4xf32> to vector<256xf32>
    %40 = vector.shape_cast %39 : vector<256xf32> to vector<256x1xf32>
    %41 = vector.broadcast %40 : vector<256x1xf32> to vector<256x4xf32>
    %42 = arith.subf %38, %41 : vector<256x4xf32>
    %43 = math.exp %42 : vector<256x4xf32>
    %cst_27 = arith.constant dense<0.000000e+00> : vector<256xf32>
    %44 = vector.multi_reduction <add>, %43, %cst_27 [1] : vector<256x4xf32> to vector<256xf32>
    %45 = vector.shape_cast %44 : vector<256xf32> to vector<256x1xf32>
    %46 = vector.broadcast %45 : vector<256x1xf32> to vector<256x4xf32>
    %47 = arith.divf %43, %46 : vector<256x4xf32>
    %c0_28 = arith.constant 0 : index
    %c0_29 = arith.constant 0 : index
    %48 = vector.load %arg10[%c0_28, %c0_29] : memref<256x4xf32, #tpu.memory_space<vmem>>, vector<256x4xf32>
    tpu.vector_store %arg10[%c0_28, %c0_29], %47 {strides = array<i32>} : memref<256x4xf32, #tpu.memory_space<vmem>>, vector<256x4xf32>,
    return
  }
  func.func @transform_0(%arg0: i32) -> (i32, i32) {
    %c0_i32 = arith.constant 0 : i32
    %c0_i32_0 = arith.constant 0 : i32
    return %arg0, %c0_i32 : i32, i32
  }
  func.func @transform_1(%arg0: i32) -> (i32, i32) {
    %c0_i32 = arith.constant 0 : i32
    %c0_i32_0 = arith.constant 0 : i32
    %c0_i32_1 = arith.constant 0 : i32
    return %c0_i32, %c0_i32_0 : i32, i32
  }
  func.func @transform_2(%arg0: i32) -> (i32, i32) {
    %c0_i32 = arith.constant 0 : i32
    %c0_i32_0 = arith.constant 0 : i32
    %c0_i32_1 = arith.constant 0 : i32
    return %c0_i32, %c0_i32_0 : i32, i32
  }
  func.func @transform_3(%arg0: i32) -> (i32, i32) {
    %c0_i32 = arith.constant 0 : i32
    %c0_i32_0 = arith.constant 0 : i32
    %c0_i32_1 = arith.constant 0 : i32
    return %c0_i32, %c0_i32_0 : i32, i32
  }
  func.func @transform_4(%arg0: i32) -> (i32, i32) {
    %c0_i32 = arith.constant 0 : i32
    %c0_i32_0 = arith.constant 0 : i32
    %c0_i32_1 = arith.constant 0 : i32
    return %c0_i32, %c0_i32_0 : i32, i32
  }
  func.func @transform_5(%arg0: i32) -> (i32, i32) {
    %c0_i32 = arith.constant 0 : i32
    %c0_i32_0 = arith.constant 0 : i32
    %c0_i32_1 = arith.constant 0 : i32
    return %c0_i32, %c0_i32_0 : i32, i32
  }
  func.func @transform_6(%arg0: i32) -> (i32, i32) {
    %c0_i32 = arith.constant 0 : i32
    %c0_i32_0 = arith.constant 0 : i32
    %c0_i32_1 = arith.constant 0 : i32
    return %c0_i32, %c0_i32_0 : i32, i32
  }
  func.func @transform_7(%arg0: i32) -> (i32, i32) {
    %c0_i32 = arith.constant 0 : i32
    %c0_i32_0 = arith.constant 0 : i32
    %c0_i32_1 = arith.constant 0 : i32
    return %c0_i32, %c0_i32_0 : i32, i32
  }
  func.func @transform_8(%arg0: i32) -> (i32, i32) {
    %c0_i32 = arith.constant 0 : i32
    %c0_i32_0 = arith.constant 0 : i32
    %c0_i32_1 = arith.constant 0 : i32
    return %c0_i32, %c0_i32_0 : i32, i32
  }
  func.func @transform_9(%arg0: i32) -> (i32, i32) {
    %c0_i32 = arith.constant 0 : i32
    %c0_i32_0 = arith.constant 0 : i32
    return %arg0, %c0_i32 : i32, i32
  }
}

</mosaic_0001>

<bundles_post_ra>
// kernel: tpu_custom_call.1
= control target key start
LH: loop header
LB: loop body
LE: loop exit
PB: predicated region body
PF: predicated region fallthrough
CT: control target
= control target key end

     0   :  { %s3574_s30 = smov 0   ;;  %s4496_s0 = inlined_call_operand.vmem [shape: bf16[512,32], index: 0, kind: input, shape index: {}]   ;;  %s4497_s1 = inlined_call_operand.vmem [shape: bf16[32,512], index: 1, kind: input, shape index: {}]   ;;  %s4498_s2 = inlined_call_operand.vmem [shape: f32[1,512], index: 2, kind: input, shape index: {}]   ;;  %s4499_s3 = inlined_call_operand.vmem [shape: bf16[512,64], index: 3, kind: input, shape index: {}]   ;;  %s4500_s4 = inlined_call_operand.vmem [shape: f32[1,64], index: 4, kind: input, shape index: {}]   ;;  %s4501_s5 = inlined_call_operand.vmem [shape: bf16[64,16], index: 5, kind: input, shape index: {}]   ;;  %s4502_s6 = inlined_call_operand.vmem [shape: f32[1,16], index: 6, kind: input, shape index: {}]   ;;  %s4503_s7 = inlined_call_operand.vmem [shape: bf16[16,4], index: 7, kind: input, shape index: {}]   ;;  %s4504_s8 = inlined_call_operand.vmem [shape: f32[1,4], index: 8, kind: input, shape index: {}]   ;;  %s4505_s9 = inlined_call_operand.vmem [shape: f32[512,4], index: 9, kind: output, shape index: {}]  }
   0x1 LB: > { %s2839_s10 = sadd.s32 4294967295, %s3521_s30   ;;  %p2843_p0 = scmp.ge.s32.totalorder %s3521_s30, 1  ;;  %s3521_s30 = sphi %s3574_s30, %s19_s30  }
   0x2   : > { %p288_p1 = scmp.lt.s32.totalorder %s3521_s30, 3 }
   0x4   : > { %p289_p2 = pnand %p2843_p0, %p288_p1 }
   0x5   : > { %s2844_s13 = sshll.u32 (!%p289_p2), %s2839_s10, 5 }
   0x6   : > { %292 = sbr.rel (%p289_p2) target bundleno = 1283 (0x503), region = 56  ;;  %p325_p3 = scmp.lt.s32.totalorder (!%p289_p2), %s2844_s13, 63 }
   0xb   : > { %v3322_v0 = vld [vmem:[%s4497_s1 + $0x24] ss:$16 sps:$4 sm:$0xff]   ;;  %v3324_v1 = vld [vmem:[%s4497_s1 + $0x2c] ss:$16 sps:$4 sm:$0xff]   ;;  %v3523_v2 = vmov 0   ;;  %s4507_s13 = smov (!%p325_p3, %s2844_s13), 63  ;;  %v380_v57 = vlaneseq }
   0xc   : > { %601 = vmatprep.mubr.bf16.mxu0 %v3523_v2  ;;  %794 = vmatprep.mubr.bf16.mxu1 %v3523_v2  ;;  %v3326_v3 = vld [vmem:[%s4497_s1 + $0x20] ss:$16 sps:$4 sm:$0xff]   ;;  %v3327_v4 = vld [vmem:[%s4497_s1 + $0x28] ss:$16 sps:$4 sm:$0xff]   ;;  %v3328_v5 = vld [vmem:[%s4497_s1 + $0x4] ss:$16 sps:$4 sm:$0xff]  }
   0xd   : > { %581 = vmatprep.subr.bf16.mxu0 %v3322_v0  ;;  %774 = vmatprep.subr.bf16.mxu1 %v3324_v1  ;;  %v3330_v6 = vld [vmem:[%s4497_s1 + $0xc] ss:$16 sps:$4 sm:$0xff]   ;;  %v3332_v7 = vld [vmem:[%s4497_s1] ss:$16 sps:$4 sm:$0xff]   ;;  %v3333_v8 = vld [vmem:[%s4497_s1 + $0x8] ss:$16 sps:$4 sm:$0xff]  }
   0xe   : > { %582 = vmatpush1.bf16.msra.mxu0 %v3326_v3  ;;  %775 = vmatpush1.bf16.msra.mxu1 %v3327_v4  ;;  %s2845_s28 = sshll.u32 %s4507_s13, 2  ;;  %v3344_v9 = vld [vmem:[%s4499_s3 + $0x78] sm:$0xff]   ;;  %vm520_vm0 = vcmask 261120   ;;  %v3350_v16 = vld [vmem:[%s4499_s3 + $0x70] sm:$0xff]   ;;  %v3356_v20 = vld [vmem:[%s4499_s3 + $0x68] sm:$0xff]   ;;  %v381_v58 = vshrl.u32 %v380_v57, 7 }
   0xf   : > { %583 = vmatprep.subr.bf16.mxu0 %v3328_v5  ;;  %776 = vmatprep.subr.bf16.mxu1 %v3330_v6  ;;  %s3614_s11 = scalar_lea.vmem %s4496_s0, %s2845_s28  ;;  %v3345_v12 = vld [vmem:[%s4499_s3 + $0x38] sm:$0xff]   ;;  %v3351_v17 = vld [vmem:[%s4499_s3 + $0x30] sm:$0xff]   ;;  %v3357_v21 = vld [vmem:[%s4499_s3 + $0x28] sm:$0xff]   ;;  %s2847_s22 = sshll.u32 %s4507_s13, 3 }
  0x10   : > { %v3334_v10 = vld [vmem:[%s3614_s11] sm:$0xff]   ;;  %v3335_v11 = vld [vmem:[%s3614_s11 + $0x8] sm:$0xff]   ;;  %v3347_v13 = vld [vmem:[%s4499_s3 + $0xf8] sm:$0xff]   ;;  %v382_v59 = vsub.s32 0, %v381_v58  ;;  %v390_v60 = vsub.s32 2, %v381_v58  ;;  %v386_v0 = vsub.s32 1, %v381_v58 }
  0x11   : > { %v3348_v14 = vld [vmem:[%s4499_s3 + $0xb8] sm:$0xff]   ;;  %v3336_v15 = vld [vmem:[%s3614_s11 + $0x10] sm:$0xff]   ;;  %v3359_v23 = vld [vmem:[%s4499_s3 + $0xe8] sm:$0xff]   ;;  %v394_v1 = vsub.s32 3, %v381_v58 }
  0x12   : > { %584 = vmatpush1.bf16.msra.mxu0 %v3332_v7  ;;  %777 = vmatpush1.bf16.msra.mxu1 %v3333_v8  ;;  %v3353_v18 = vld [vmem:[%s4499_s3 + $0xf0] sm:$0xff]   ;;  %v3337_v22 = vld [vmem:[%s3614_s11 + $0x18] sm:$0xff]   ;;  %v3360_v24 = vld [vmem:[%s4499_s3 + $0xa8] sm:$0xff]  }
  0x13   : > { %2978 = vmatprep.subr.bf16.mxu0 %v3344_v9  ;;  %3090 = vmatprep.subr.bf16.mxu1 %v3347_v13  ;;  %v3354_v19 = vld [vmem:[%s4499_s3 + $0xb0] sm:$0xff]   ;;  %v3362_v25 = vld [vmem:[%s4499_s3 + $0x60] sm:$0xff]   ;;  %v3366_v30 = vld [vmem:[%s4499_s3 + $0x58] sm:$0xff]  }
  0x14   : > { %v3363_v26 = vld [vmem:[%s4499_s3 + $0x20] sm:$0xff]   ;;  %v3367_v31 = vld [vmem:[%s4499_s3 + $0x18] sm:$0xff]   ;;  %v3370_v34 = vld [vmem:[%s4499_s3 + $0x50] sm:$0xff]  }
  0x15   : > { %2872 = vmatmul.mubr.msk.bf16.vlgmr.msra.gmra.mxu0 %vm520_vm0, %v3334_v10  ;;  %2888 = vmatmul.mubr.msk.bf16.vlgmr.msra.gmra.mxu1 %vm520_vm0, %v3334_v10  ;;  %v3364_v27 = vld [vmem:[%s4499_s3 + $0xe0] sm:$0xff]   ;;  %v3368_v32 = vld [vmem:[%s4499_s3 + $0xd8] sm:$0xff]   ;;  %v3371_v35 = vld [vmem:[%s4499_s3 + $0x10] sm:$0xff]  }
  0x16   : > { %611 = vmatprep.mubr.bf16.mxu0 %v3523_v2  ;;  %804 = vmatprep.mubr.bf16.mxu1 %v3523_v2  ;;  %v3338_v28 = vld [vmem:[%s3614_s11 + $0x20] sm:$0xff]   ;;  %v3369_v33 = vld [vmem:[%s4499_s3 + $0x98] sm:$0xff]   ;;  %v3372_v36 = vld [vmem:[%s4499_s3 + $0xd0] sm:$0xff]  }
  0x17   : > { %2979 = vmatpush3.bf16.msra.mxu0 %v3345_v12  ;;  %3091 = vmatpush3.bf16.msra.mxu1 %v3348_v14  ;;  %v3365_v29 = vld [vmem:[%s4499_s3 + $0xa0] sm:$0xff]   ;;  %v3339_v37 = vld [vmem:[%s3614_s11 + $0x28] sm:$0xff]   ;;  %v3373_v38 = vld [vmem:[%s4499_s3 + $0x90] sm:$0xff]  }
  0x18   : > { %2980 = vmatprep.subr.bf16.mxu0 %v3350_v16  ;;  %3092 = vmatprep.subr.bf16.mxu1 %v3353_v18  ;;  %v3374_v39 = vld [vmem:[%s4499_s3 + $0x48] sm:$0xff]   ;;  %v3378_v43 = vld [vmem:[%s4499_s3 + $0x40] sm:$0xff]   ;;  %v3340_v45 = vld [vmem:[%s3614_s11 + $0x30] sm:$0xff]  }
  0x19   : > { %v3375_v40 = vld [vmem:[%s4499_s3 + $0x8] sm:$0xff]   ;;  %v3379_v44 = vld [vmem:[%s4499_s3] sm:$0xff]   ;;  %v3341_v46 = vld [vmem:[%s3614_s11 + $0x38] sm:$0xff]  }
  0x1a   : > { %v3376_v41 = vld [vmem:[%s4499_s3 + $0xc8] sm:$0xff]   ;;  %v3342_v47 = vld [vmem:[%s3614_s11 + $0x40] sm:$0xff]   ;;  %v3346_v51 = vld [vmem:[%s3614_s11 + $0x50] sm:$0xff]  }
  0x1b   : > { %2981 = vmatpush3.bf16.msra.mxu0 %v3351_v17  ;;  %3093 = vmatpush3.bf16.msra.mxu1 %v3354_v19  ;;  %v3377_v42 = vld [vmem:[%s4499_s3 + $0x88] sm:$0xff]   ;;  %v3380_v48 = vld [vmem:[%s4499_s3 + $0xc0] sm:$0xff]   ;;  %v3349_v52 = vld [vmem:[%s3614_s11 + $0x58] sm:$0xff]  }
  0x1c   : > { %2982 = vmatprep.subr.bf16.mxu0 %v3356_v20  ;;  %3094 = vmatprep.subr.bf16.mxu1 %v3359_v23  ;;  %v3381_v49 = vld [vmem:[%s4499_s3 + $0x80] sm:$0xff]   ;;  %v3343_v50 = vld [vmem:[%s3614_s11 + $0x48] sm:$0xff]   ;;  %v3358_v55 = vld [vmem:[%s3614_s11 + $0x70] sm:$0xff]  }
  0x1d   : > { %2873 = vmatmul.mubr.msk.bf16.gmra.mxu0 %vm520_vm0, %v3335_v11  ;;  %2889 = vmatmul.mubr.msk.bf16.gmra.mxu1 %vm520_vm0, %v3335_v11  ;;  %v3352_v53 = vld [vmem:[%s3614_s11 + $0x60] sm:$0xff]   ;;  %v3355_v54 = vld [vmem:[%s3614_s11 + $0x68] sm:$0xff]   ;;  %v3361_v56 = vld [vmem:[%s3614_s11 + $0x78] sm:$0xff]   ;;  %s4395_s11 = scalar_lea.vmem %s4505_s9, %s2847_s22 }
  0x1e   : > { %621 = vmatprep.mubr.bf16.mxu0 %v3523_v2  ;;  %814 = vmatprep.mubr.bf16.mxu1 %v3523_v2  ;;  %v378_v61 = vld [vmem:[%s4498_s2] sm:$0xf] }
  0x1f   : > { %2983 = vmatpush3.bf16.msra.mxu0 %v3357_v21  ;;  %3095 = vmatpush3.bf16.msra.mxu1 %v3360_v24  ;;  %v3793_v3 = vrot.slane %v378_v61, %v382_v59  ;;  %v3797_v6 = vrot.slane %v378_v61, %v386_v0  ;;  %v3799_v7 = vrot.slane %v378_v61, %v394_v1 }
  0x20   : > { %2984 = vmatprep.subr.bf16.mxu0 %v3362_v25  ;;  %3096 = vmatprep.subr.bf16.mxu1 %v3364_v27 }
  0x23   : > { %2985 = vmatpush3.bf16.msra.mxu0 %v3363_v26  ;;  %3097 = vmatpush3.bf16.msra.mxu1 %v3365_v29 }
  0x24   : > { %2986 = vmatprep.subr.bf16.mxu0 %v3366_v30  ;;  %3098 = vmatprep.subr.bf16.mxu1 %v3368_v32 }
  0x25   : > { %2874 = vmatmul.mubr.msk.bf16.gmra.mxu0 %vm520_vm0, %v3336_v15  ;;  %2890 = vmatmul.mubr.msk.bf16.gmra.mxu1 %vm520_vm0, %v3336_v15 }
  0x26   : > { %631 = vmatprep.mubr.bf16.mxu0 %v3523_v2  ;;  %824 = vmatprep.mubr.bf16.mxu1 %v3523_v2 }
  0x27   : > { %2987 = vmatpush3.bf16.msra.mxu0 %v3367_v31  ;;  %3099 = vmatpush3.bf16.msra.mxu1 %v3369_v33 }
  0x28   : > { %2988 = vmatprep.subr.bf16.mxu0 %v3370_v34  ;;  %3100 = vmatprep.subr.bf16.mxu1 %v3372_v36 }
  0x2b   : > { %2989 = vmatpush3.bf16.msra.mxu0 %v3371_v35  ;;  %3101 = vmatpush3.bf16.msra.mxu1 %v3373_v38 }
  0x2c   : > { %2990 = vmatprep.subr.bf16.mxu0 %v3374_v39  ;;  %3102 = vmatprep.subr.bf16.mxu1 %v3376_v41 }
  0x2d   : > { %2875 = vmatmul.mubr.msk.bf16.gmra.mxu0 %vm520_vm0, %v3337_v22  ;;  %2891 = vmatmul.mubr.msk.bf16.gmra.mxu1 %vm520_vm0, %v3337_v22 }
  0x2e   : > { %641 = vmatprep.mubr.bf16.mxu0 %v3523_v2  ;;  %834 = vmatprep.mubr.bf16.mxu1 %v3523_v2 }
  0x2f   : > { %2991 = vmatpush3.bf16.msra.mxu0 %v3375_v40  ;;  %3103 = vmatpush3.bf16.msra.mxu1 %v3377_v42 }
  0x30   : > { %2992 = vmatprep.subr.bf16.mxu0 %v3378_v43  ;;  %3104 = vmatprep.subr.bf16.mxu1 %v3380_v48 }
  0x33   : > { %2993 = vmatpush3.bf16.msra.mxu0 %v3379_v44  ;;  %3105 = vmatpush3.bf16.msra.mxu1 %v3381_v49  ;;  %v3383_v49 = vld [vmem:[%s4501_s5 + $0x10] sm:$0xff]  }
  0x35   : > { %2876 = vmatmul.mubr.msk.bf16.gmra.mxu0 %vm520_vm0, %v3338_v28  ;;  %2892 = vmatmul.mubr.msk.bf16.gmra.mxu1 %vm520_vm0, %v3338_v28  ;;  %v3382_v28 = vld [vmem:[%s4501_s5 + $0x18] sm:$0xff]  }
  0x36   : > { %651 = vmatprep.mubr.bf16.mxu0 %v3523_v2  ;;  %844 = vmatprep.mubr.bf16.mxu1 %v3523_v2 }
  0x37   : > { %3239 = vmatprep.subr.bf16.mxu0 %v3382_v28 }
  0x3d   : > { %2877 = vmatmul.mubr.msk.bf16.gmra.mxu0 %vm520_vm0, %v3339_v37  ;;  %2893 = vmatmul.mubr.msk.bf16.gmra.mxu1 %vm520_vm0, %v3339_v37 }
  0x3e   : > { %661 = vmatprep.mubr.bf16.mxu0 %v3523_v2  ;;  %854 = vmatprep.mubr.bf16.mxu1 %v3523_v2 }
  0x45   : > { %2878 = vmatmul.mubr.msk.bf16.gmra.mxu0 %vm520_vm0, %v3340_v45  ;;  %2894 = vmatmul.mubr.msk.bf16.gmra.mxu1 %vm520_vm0, %v3340_v45 }
  0x46   : > { %671 = vmatprep.mubr.bf16.mxu0 %v3523_v2  ;;  %864 = vmatprep.mubr.bf16.mxu1 %v3523_v2 }
  0x4d   : > { %2879 = vmatmul.mubr.msk.bf16.gmra.mxu0 %vm520_vm0, %v3341_v46  ;;  %2895 = vmatmul.mubr.msk.bf16.gmra.mxu1 %vm520_vm0, %v3341_v46 }
  0x4e   : > { %681 = vmatprep.mubr.bf16.mxu0 %v3523_v2  ;;  %874 = vmatprep.mubr.bf16.mxu1 %v3523_v2 }
  0x55   : > { %2880 = vmatmul.mubr.msk.bf16.gmra.mxu0 %vm520_vm0, %v3342_v47  ;;  %2896 = vmatmul.mubr.msk.bf16.gmra.mxu1 %vm520_vm0, %v3342_v47 }
  0x56   : > { %691 = vmatprep.mubr.bf16.mxu0 %v3523_v2  ;;  %884 = vmatprep.mubr.bf16.mxu1 %v3523_v2 }
  0x5d   : > { %2881 = vmatmul.mubr.msk.bf16.gmra.mxu0 %vm520_vm0, %v3343_v50  ;;  %2897 = vmatmul.mubr.msk.bf16.gmra.mxu1 %vm520_vm0, %v3343_v50 }
  0x5e   : > { %701 = vmatprep.mubr.bf16.mxu0 %v3523_v2  ;;  %894 = vmatprep.mubr.bf16.mxu1 %v3523_v2 }
  0x65   : > { %2882 = vmatmul.mubr.msk.bf16.gmra.mxu0 %vm520_vm0, %v3346_v51  ;;  %2898 = vmatmul.mubr.msk.bf16.gmra.mxu1 %vm520_vm0, %v3346_v51 }
  0x66   : > { %711 = vmatprep.mubr.bf16.mxu0 %v3523_v2  ;;  %904 = vmatprep.mubr.bf16.mxu1 %v3523_v2 }
  0x6d   : > { %2883 = vmatmul.mubr.msk.bf16.gmra.mxu0 %vm520_vm0, %v3349_v52  ;;  %2899 = vmatmul.mubr.msk.bf16.gmra.mxu1 %vm520_vm0, %v3349_v52 }
  0x6e   : > { %721 = vmatprep.mubr.bf16.mxu0 %v3523_v2  ;;  %914 = vmatprep.mubr.bf16.mxu1 %v3523_v2 }
  0x75   : > { %2884 = vmatmul.mubr.msk.bf16.gmra.mxu0 %vm520_vm0, %v3352_v53  ;;  %2900 = vmatmul.mubr.msk.bf16.gmra.mxu1 %vm520_vm0, %v3352_v53 }
  0x76   : > { %731 = vmatprep.mubr.bf16.mxu0 %v3523_v2  ;;  %924 = vmatprep.mubr.bf16.mxu1 %v3523_v2 }
  0x7d   : > { %2885 = vmatmul.mubr.msk.bf16.gmra.mxu0 %vm520_vm0, %v3355_v54  ;;  %2901 = vmatmul.mubr.msk.bf16.gmra.mxu1 %vm520_vm0, %v3355_v54 }
  0x7e   : > { %741 = vmatprep.mubr.bf16.mxu0 %v3523_v2  ;;  %934 = vmatprep.mubr.bf16.mxu1 %v3523_v2 }
  0x85   : > { %2886 = vmatmul.mubr.msk.bf16.gmra.mxu0 %vm520_vm0, %v3358_v55  ;;  %2902 = vmatmul.mubr.msk.bf16.gmra.mxu1 %vm520_vm0, %v3358_v55 }
  0x86   : > { %751 = vmatprep.mubr.bf16.mxu0 %v3523_v2  ;;  %944 = vmatprep.mubr.bf16.mxu1 %v3523_v2  ;;  %v3795_v2 = vrot.slane %v378_v61, %v390_v60 }
  0x8d   : > { %2887 = vmatmul.mubr.msk.bf16.gmra.mxu0 %vm520_vm0, %v3361_v56  ;;  %2903 = vmatmul.mubr.msk.bf16.gmra.mxu1 %vm520_vm0, %v3361_v56 }
  0xd5   : > { %v603_v62 = vpop.f32.mrf.mxu0  ;;  %v796_v63 = vpop.f32.mrf.mxu1 }
  0xd6   : > { %v604_v10 = vadd.f32 %v603_v62, %v3793_v3  ;;  %v797_v11 = vadd.f32 %v796_v63, %v3795_v2 }
  0xd7   : > { %v605_v4 = vpop.f32.mrf.mxu0  ;;  %v798_v5 = vpop.f32.mrf.mxu1 }
  0xd8   : > { %v606_v20 = vadd.f32 %v605_v4, %v3797_v6  ;;  %v799_v21 = vadd.f32 %v798_v5, %v3799_v7 }
  0xd9   : > { %v607_v8 = vpop.f32.mrf.mxu0  ;;  %v800_v9 = vpop.f32.mrf.mxu1 }
  0xda   : > { %v608_v12 = vadd.f32 %v607_v8, %v3793_v3  ;;  %v801_v13 = vadd.f32 %v800_v9, %v3795_v2 }
  0xdb   : > { %v609_v14 = vpop.f32.mrf.mxu0  ;;  %v802_v15 = vpop.f32.mrf.mxu1 }
  0xdc   : > { %v955_v16 = vpack.c.bf16 %v608_v12, %v604_v10  ;;  %v957_v17 = vpack.c.bf16 %v801_v13, %v797_v11  ;;  %v610_v18 = vadd.f32 %v609_v14, %v3797_v6  ;;  %v803_v19 = vadd.f32 %v802_v15, %v3799_v7 }
  0xdd   : > { %v613_v22 = vpop.f32.mrf.mxu0  ;;  %v806_v23 = vpop.f32.mrf.mxu1 }
  0xde   : > { %v956_v24 = vpack.c.bf16 %v610_v18, %v606_v20  ;;  %v958_v25 = vpack.c.bf16 %v803_v19, %v799_v21  ;;  %vm1019_vm1 = vcmp.gt.bf16.partialorder %v955_v16, 0  ;;  %v1083_v29 = vmul.bf16 1036860877, %v955_v16 }
  0xdf   : > { %v615_v26 = vpop.f32.mrf.mxu0  ;;  %v808_v27 = vpop.f32.mrf.mxu1  ;;  %vm1021_vm2 = vcmp.gt.bf16.partialorder %v957_v17, 0  ;;  %v1085_v30 = vmul.bf16 1036860877, %v957_v17  ;;  %v614_v35 = vadd.f32 %v613_v22, %v3793_v3  ;;  %v807_v36 = vadd.f32 %v806_v23, %v3795_v2 }
  0xe0   : > { %vm1020_vm3 = vcmp.gt.bf16.partialorder %v956_v24, 0  ;;  %v1084_v33 = vmul.bf16 1036860877, %v956_v24  ;;  %vm1022_vm4 = vcmp.gt.bf16.partialorder %v958_v25, 0  ;;  %v1086_v34 = vmul.bf16 1036860877, %v958_v25 }
  0xe1   : > { %v617_v31 = vpop.f32.mrf.mxu0  ;;  %v810_v32 = vpop.f32.mrf.mxu1  ;;  %v616_v39 = vadd.f32 %v615_v26, %v3797_v6  ;;  %v809_v40 = vadd.f32 %v808_v27, %v3799_v7  ;;  %v1147_v48 = vsel %vm1019_vm1, %v955_v16, %v1083_v29  ;;  %v1149_v51 = vsel %vm1021_vm2, %v957_v17, %v1085_v30 }
  0xe2   : > { %v618_v37 = vadd.f32 %v617_v31, %v3793_v3  ;;  %v811_v38 = vadd.f32 %v810_v32, %v3795_v2  ;;  %v1148_v43 = vsel %vm1020_vm3, %v956_v24, %v1084_v33  ;;  %v1150_v44 = vsel %vm1022_vm4, %v958_v25, %v1086_v34 }
  0xe3   : > { %v619_v41 = vpop.f32.mrf.mxu0  ;;  %v812_v42 = vpop.f32.mrf.mxu1  ;;  %1506 = vmatprep.mubr.bf16.mxu0 %v1148_v43  ;;  %1667 = vmatprep.mubr.bf16.mxu1 %v1150_v44 }
  0xe4   : > { %v959_v45 = vpack.c.bf16 %v618_v37, %v614_v35  ;;  %v620_v46 = vadd.f32 %v619_v41, %v3797_v6  ;;  %v813_v47 = vadd.f32 %v812_v42, %v3799_v7  ;;  %v961_v50 = vpack.c.bf16 %v811_v38, %v807_v36  ;;  %1507 = vmatmul.mubr.bf16.vlgmr.msra.gmra.mxu0 %v1147_v48 }
  0xe5   : > { %v623_v52 = vpop.f32.mrf.mxu0  ;;  %v816_v53 = vpop.f32.mrf.mxu1  ;;  %1668 = vmatmul.mubr.bf16.vlgmr.msra.gmra.mxu1 %v1149_v51  ;;  %3240 = vmatpush3.bf16.msra.mxu0 %v3382_v28 }
  0xe6   : > { %v960_v54 = vpack.c.bf16 %v620_v46, %v616_v39  ;;  %v962_v55 = vpack.c.bf16 %v813_v47, %v809_v40  ;;  %v624_v56 = vadd.f32 %v623_v52, %v3793_v3  ;;  %v817_v59 = vadd.f32 %v816_v53, %v3795_v2  ;;  %3241 = vmatprep.subr.bf16.mxu0 %v3383_v49 }
  0xe7   : > { %v625_v57 = vpop.f32.mrf.mxu0  ;;  %v818_v58 = vpop.f32.mrf.mxu1  ;;  %v1087_v61 = vmul.bf16 1036860877, %v959_v45  ;;  %vm1023_vm7 = vcmp.gt.bf16.partialorder %v959_v45, 0  ;;  %v1089_v1 = vmul.bf16 1036860877, %v961_v50  ;;  %vm1025_vm8 = vcmp.gt.bf16.partialorder %v961_v50, 0 }
  0xe8   : > { %vm1024_vm5 = vcmp.gt.bf16.partialorder %v960_v54, 0  ;;  %v1088_v60 = vmul.bf16 1036860877, %v960_v54  ;;  %vm1026_vm6 = vcmp.gt.bf16.partialorder %v962_v55, 0  ;;  %v1090_v0 = vmul.bf16 1036860877, %v962_v55 }
  0xe9   : > { %v627_v62 = vpop.f32.mrf.mxu0  ;;  %v820_v63 = vpop.f32.mrf.mxu1  ;;  %v626_v9 = vadd.f32 %v625_v57, %v3797_v6  ;;  %v819_v10 = vadd.f32 %v818_v58, %v3799_v7  ;;  %3242 = vmatpush3.bf16.msra.mxu0 %v3383_v49  ;;  %v1151_v17 = vsel %vm1023_vm7, %v959_v45, %v1087_v61  ;;  %v1153_v19 = vsel %vm1025_vm8, %v961_v50, %v1089_v1 }
  0xea   : > { %v628_v4 = vadd.f32 %v627_v62, %v3793_v3  ;;  %v821_v5 = vadd.f32 %v820_v63, %v3795_v2  ;;  %v1152_v8 = vsel %vm1024_vm5, %v960_v54, %v1088_v60  ;;  %v1154_v13 = vsel %vm1026_vm6, %v962_v55, %v1090_v0 }
  0xeb   : > { %v629_v11 = vpop.f32.mrf.mxu0  ;;  %v822_v12 = vpop.f32.mrf.mxu1  ;;  %1514 = vmatprep.mubr.bf16.mxu0 %v1152_v8  ;;  %1675 = vmatprep.mubr.bf16.mxu1 %v1154_v13 }
  0xec   : > { %v963_v14 = vpack.c.bf16 %v628_v4, %v624_v56  ;;  %v630_v15 = vadd.f32 %v629_v11, %v3797_v6  ;;  %v823_v16 = vadd.f32 %v822_v12, %v3799_v7  ;;  %v965_v18 = vpack.c.bf16 %v821_v5, %v817_v59  ;;  %1515 = vmatmul.mubr.bf16.gmra.mxu0 %v1151_v17 }
  0xed   : > { %v633_v20 = vpop.f32.mrf.mxu0  ;;  %v826_v21 = vpop.f32.mrf.mxu1  ;;  %1676 = vmatmul.mubr.bf16.gmra.mxu1 %v1153_v19 }
  0xee   : > { %v964_v22 = vpack.c.bf16 %v630_v15, %v626_v9  ;;  %v966_v23 = vpack.c.bf16 %v823_v16, %v819_v10  ;;  %v634_v26 = vadd.f32 %v633_v20, %v3793_v3  ;;  %v1091_v28 = vmul.bf16 1036860877, %v963_v14 }
  0xef   : > { %v635_v24 = vpop.f32.mrf.mxu0  ;;  %v828_v25 = vpop.f32.mrf.mxu1  ;;  %vm1027_vm11 = vcmp.gt.bf16.partialorder %v963_v14, 0  ;;  %v1093_v32 = vmul.bf16 1036860877, %v965_v18  ;;  %vm1029_vm12 = vcmp.gt.bf16.partialorder %v965_v18, 0  ;;  %v827_v36 = vadd.f32 %v826_v21, %v3795_v2 }
  0xf0   : > { %vm1028_vm9 = vcmp.gt.bf16.partialorder %v964_v22, 0  ;;  %v1092_v27 = vmul.bf16 1036860877, %v964_v22  ;;  %vm1030_vm10 = vcmp.gt.bf16.partialorder %v966_v23, 0  ;;  %v1094_v31 = vmul.bf16 1036860877, %v966_v23 }
  0xf1   : > { %v637_v29 = vpop.f32.mrf.mxu0  ;;  %v830_v30 = vpop.f32.mrf.mxu1  ;;  %v636_v37 = vadd.f32 %v635_v24, %v3797_v6  ;;  %v829_v38 = vadd.f32 %v828_v25, %v3799_v7  ;;  %v1155_v45 = vsel %vm1027_vm11, %v963_v14, %v1091_v28  ;;  %v1157_v47 = vsel %vm1029_vm12, %v965_v18, %v1093_v32 }
  0xf2   : > { %v638_v33 = vadd.f32 %v637_v29, %v3793_v3  ;;  %v831_v34 = vadd.f32 %v830_v30, %v3795_v2  ;;  %v1156_v35 = vsel %vm1028_vm9, %v964_v22, %v1092_v27  ;;  %v1158_v41 = vsel %vm1030_vm10, %v966_v23, %v1094_v31 }
  0xf3   : > { %v639_v39 = vpop.f32.mrf.mxu0  ;;  %v832_v40 = vpop.f32.mrf.mxu1  ;;  %1522 = vmatprep.mubr.bf16.mxu0 %v1156_v35  ;;  %1683 = vmatprep.mubr.bf16.mxu1 %v1158_v41 }
  0xf4   : > { %v967_v42 = vpack.c.bf16 %v638_v33, %v634_v26  ;;  %v640_v43 = vadd.f32 %v639_v39, %v3797_v6  ;;  %v833_v44 = vadd.f32 %v832_v40, %v3799_v7  ;;  %v969_v46 = vpack.c.bf16 %v831_v34, %v827_v36  ;;  %1523 = vmatmul.mubr.bf16.gmra.mxu0 %v1155_v45 }
  0xf5   : > { %v643_v48 = vpop.f32.mrf.mxu0  ;;  %v836_v49 = vpop.f32.mrf.mxu1  ;;  %1684 = vmatmul.mubr.bf16.gmra.mxu1 %v1157_v47 }
  0xf6   : > { %v968_v50 = vpack.c.bf16 %v640_v43, %v636_v37  ;;  %v970_v51 = vpack.c.bf16 %v833_v44, %v829_v38  ;;  %v644_v54 = vadd.f32 %v643_v48, %v3793_v3  ;;  %v1095_v56 = vmul.bf16 1036860877, %v967_v42 }
  0xf7   : > { %v645_v52 = vpop.f32.mrf.mxu0  ;;  %v838_v53 = vpop.f32.mrf.mxu1  ;;  %vm1031_vm15 = vcmp.gt.bf16.partialorder %v967_v42, 0  ;;  %v1097_v60 = vmul.bf16 1036860877, %v969_v46  ;;  %vm1033_vm0 = vcmp.gt.bf16.partialorder %v969_v46, 0  ;;  %v837_v0 = vadd.f32 %v836_v49, %v3795_v2 }
  0xf8   : > { %vm1032_vm13 = vcmp.gt.bf16.partialorder %v968_v50, 0  ;;  %v1096_v55 = vmul.bf16 1036860877, %v968_v50  ;;  %vm1034_vm14 = vcmp.gt.bf16.partialorder %v970_v51, 0  ;;  %v1098_v59 = vmul.bf16 1036860877, %v970_v51 }
  0xf9   : > { %v647_v57 = vpop.f32.mrf.mxu0  ;;  %v840_v58 = vpop.f32.mrf.mxu1  ;;  %v646_v1 = vadd.f32 %v645_v52, %v3797_v6  ;;  %v839_v4 = vadd.f32 %v838_v53, %v3799_v7  ;;  %v1159_v13 = vsel %vm1031_vm15, %v967_v42, %v1095_v56  ;;  %v1161_v15 = vsel %vm1033_vm0, %v969_v46, %v1097_v60 }
  0xfa   : > { %v648_v61 = vadd.f32 %v647_v57, %v3793_v3  ;;  %v841_v62 = vadd.f32 %v840_v58, %v3795_v2  ;;  %v1160_v63 = vsel %vm1032_vm13, %v968_v50, %v1096_v55  ;;  %v1162_v9 = vsel %vm1034_vm14, %v970_v51, %v1098_v59 }
  0xfb   : > { %v649_v5 = vpop.f32.mrf.mxu0  ;;  %v842_v8 = vpop.f32.mrf.mxu1  ;;  %1530 = vmatprep.mubr.bf16.mxu0 %v1160_v63  ;;  %1691 = vmatprep.mubr.bf16.mxu1 %v1162_v9 }
  0xfc   : > { %v971_v10 = vpack.c.bf16 %v648_v61, %v644_v54  ;;  %v650_v11 = vadd.f32 %v649_v5, %v3797_v6  ;;  %v843_v12 = vadd.f32 %v842_v8, %v3799_v7  ;;  %v973_v14 = vpack.c.bf16 %v841_v62, %v837_v0  ;;  %1531 = vmatmul.mubr.bf16.gmra.mxu0 %v1159_v13 }
  0xfd   : > { %v653_v16 = vpop.f32.mrf.mxu0  ;;  %v846_v17 = vpop.f32.mrf.mxu1  ;;  %1692 = vmatmul.mubr.bf16.gmra.mxu1 %v1161_v15 }
  0xfe   : > { %v972_v18 = vpack.c.bf16 %v650_v11, %v646_v1  ;;  %v974_v19 = vpack.c.bf16 %v843_v12, %v839_v4  ;;  %v654_v22 = vadd.f32 %v653_v16, %v3793_v3  ;;  %v1099_v24 = vmul.bf16 1036860877, %v971_v10 }
  0xff   : > { %v655_v20 = vpop.f32.mrf.mxu0  ;;  %v848_v21 = vpop.f32.mrf.mxu1  ;;  %vm1035_vm3 = vcmp.gt.bf16.partialorder %v971_v10, 0  ;;  %v1101_v28 = vmul.bf16 1036860877, %v973_v14  ;;  %vm1037_vm4 = vcmp.gt.bf16.partialorder %v973_v14, 0  ;;  %v847_v32 = vadd.f32 %v846_v17, %v3795_v2 }
 0x100   : > { %vm1036_vm1 = vcmp.gt.bf16.partialorder %v972_v18, 0  ;;  %v1100_v23 = vmul.bf16 1036860877, %v972_v18  ;;  %vm1038_vm2 = vcmp.gt.bf16.partialorder %v974_v19, 0  ;;  %v1102_v27 = vmul.bf16 1036860877, %v974_v19 }
 0x101   : > { %v657_v25 = vpop.f32.mrf.mxu0  ;;  %v850_v26 = vpop.f32.mrf.mxu1  ;;  %v656_v33 = vadd.f32 %v655_v20, %v3797_v6  ;;  %v849_v34 = vadd.f32 %v848_v21, %v3799_v7  ;;  %v1163_v41 = vsel %vm1035_vm3, %v971_v10, %v1099_v24  ;;  %v1165_v43 = vsel %vm1037_vm4, %v973_v14, %v1101_v28 }
 0x102   : > { %v658_v29 = vadd.f32 %v657_v25, %v3793_v3  ;;  %v851_v30 = vadd.f32 %v850_v26, %v3795_v2  ;;  %v1164_v31 = vsel %vm1036_vm1, %v972_v18, %v1100_v23  ;;  %v1166_v37 = vsel %vm1038_vm2, %v974_v19, %v1102_v27 }
 0x103   : > { %v659_v35 = vpop.f32.mrf.mxu0  ;;  %v852_v36 = vpop.f32.mrf.mxu1  ;;  %1538 = vmatprep.mubr.bf16.mxu0 %v1164_v31  ;;  %1699 = vmatprep.mubr.bf16.mxu1 %v1166_v37 }
 0x104   : > { %v975_v38 = vpack.c.bf16 %v658_v29, %v654_v22  ;;  %v660_v39 = vadd.f32 %v659_v35, %v3797_v6  ;;  %v853_v40 = vadd.f32 %v852_v36, %v3799_v7  ;;  %v977_v42 = vpack.c.bf16 %v851_v30, %v847_v32  ;;  %1539 = vmatmul.mubr.bf16.gmra.mxu0 %v1163_v41 }
 0x105   : > { %v663_v44 = vpop.f32.mrf.mxu0  ;;  %v856_v45 = vpop.f32.mrf.mxu1  ;;  %1700 = vmatmul.mubr.bf16.gmra.mxu1 %v1165_v43 }
 0x106   : > { %v976_v46 = vpack.c.bf16 %v660_v39, %v656_v33  ;;  %v978_v47 = vpack.c.bf16 %v853_v40, %v849_v34  ;;  %v664_v50 = vadd.f32 %v663_v44, %v3793_v3  ;;  %v1103_v52 = vmul.bf16 1036860877, %v975_v38 }
 0x107   : > { %v665_v48 = vpop.f32.mrf.mxu0  ;;  %v858_v49 = vpop.f32.mrf.mxu1  ;;  %vm1039_vm7 = vcmp.gt.bf16.partialorder %v975_v38, 0  ;;  %v1105_v56 = vmul.bf16 1036860877, %v977_v42  ;;  %vm1041_vm8 = vcmp.gt.bf16.partialorder %v977_v42, 0  ;;  %v857_v60 = vadd.f32 %v856_v45, %v3795_v2 }
 0x108   : > { %vm1040_vm5 = vcmp.gt.bf16.partialorder %v976_v46, 0  ;;  %v1104_v51 = vmul.bf16 1036860877, %v976_v46  ;;  %vm1042_vm6 = vcmp.gt.bf16.partialorder %v978_v47, 0  ;;  %v1106_v55 = vmul.bf16 1036860877, %v978_v47 }
 0x109   : > { %v667_v53 = vpop.f32.mrf.mxu0  ;;  %v860_v54 = vpop.f32.mrf.mxu1  ;;  %v666_v61 = vadd.f32 %v665_v48, %v3797_v6  ;;  %v859_v62 = vadd.f32 %v858_v49, %v3799_v7  ;;  %v1167_v9 = vsel %vm1039_vm7, %v975_v38, %v1103_v52  ;;  %v1169_v11 = vsel %vm1041_vm8, %v977_v42, %v1105_v56 }
 0x10a   : > { %v668_v57 = vadd.f32 %v667_v53, %v3793_v3  ;;  %v861_v58 = vadd.f32 %v860_v54, %v3795_v2  ;;  %v1168_v59 = vsel %vm1040_vm5, %v976_v46, %v1104_v51  ;;  %v1170_v1 = vsel %vm1042_vm6, %v978_v47, %v1106_v55 }
 0x10b   : > { %v669_v63 = vpop.f32.mrf.mxu0  ;;  %v862_v0 = vpop.f32.mrf.mxu1  ;;  %1546 = vmatprep.mubr.bf16.mxu0 %v1168_v59  ;;  %1707 = vmatprep.mubr.bf16.mxu1 %v1170_v1 }
 0x10c   : > { %v979_v4 = vpack.c.bf16 %v668_v57, %v664_v50  ;;  %v670_v5 = vadd.f32 %v669_v63, %v3797_v6  ;;  %v863_v8 = vadd.f32 %v862_v0, %v3799_v7  ;;  %v981_v10 = vpack.c.bf16 %v861_v58, %v857_v60  ;;  %1547 = vmatmul.mubr.bf16.gmra.mxu0 %v1167_v9 }
 0x10d   : > { %v673_v12 = vpop.f32.mrf.mxu0  ;;  %v866_v13 = vpop.f32.mrf.mxu1  ;;  %1708 = vmatmul.mubr.bf16.gmra.mxu1 %v1169_v11 }
 0x10e   : > { %v980_v14 = vpack.c.bf16 %v670_v5, %v666_v61  ;;  %v982_v15 = vpack.c.bf16 %v863_v8, %v859_v62  ;;  %v674_v18 = vadd.f32 %v673_v12, %v3793_v3  ;;  %v1107_v20 = vmul.bf16 1036860877, %v979_v4 }
 0x10f   : > { %v675_v16 = vpop.f32.mrf.mxu0  ;;  %v868_v17 = vpop.f32.mrf.mxu1  ;;  %vm1043_vm11 = vcmp.gt.bf16.partialorder %v979_v4, 0  ;;  %v1109_v24 = vmul.bf16 1036860877, %v981_v10  ;;  %vm1045_vm12 = vcmp.gt.bf16.partialorder %v981_v10, 0  ;;  %v867_v28 = vadd.f32 %v866_v13, %v3795_v2 }
 0x110   : > { %vm1044_vm9 = vcmp.gt.bf16.partialorder %v980_v14, 0  ;;  %v1108_v19 = vmul.bf16 1036860877, %v980_v14  ;;  %vm1046_vm10 = vcmp.gt.bf16.partialorder %v982_v15, 0  ;;  %v1110_v23 = vmul.bf16 1036860877, %v982_v15 }
 0x111   : > { %v677_v21 = vpop.f32.mrf.mxu0  ;;  %v870_v22 = vpop.f32.mrf.mxu1  ;;  %v676_v29 = vadd.f32 %v675_v16, %v3797_v6  ;;  %v869_v30 = vadd.f32 %v868_v17, %v3799_v7  ;;  %v1171_v37 = vsel %vm1043_vm11, %v979_v4, %v1107_v20  ;;  %v1173_v39 = vsel %vm1045_vm12, %v981_v10, %v1109_v24 }
 0x112   : > { %v678_v25 = vadd.f32 %v677_v21, %v3793_v3  ;;  %v871_v26 = vadd.f32 %v870_v22, %v3795_v2  ;;  %v1172_v27 = vsel %vm1044_vm9, %v980_v14, %v1108_v19  ;;  %v1174_v33 = vsel %vm1046_vm10, %v982_v15, %v1110_v23 }
 0x113   : > { %v679_v31 = vpop.f32.mrf.mxu0  ;;  %v872_v32 = vpop.f32.mrf.mxu1  ;;  %1554 = vmatprep.mubr.bf16.mxu0 %v1172_v27  ;;  %1715 = vmatprep.mubr.bf16.mxu1 %v1174_v33 }
 0x114   : > { %v983_v34 = vpack.c.bf16 %v678_v25, %v674_v18  ;;  %v680_v35 = vadd.f32 %v679_v31, %v3797_v6  ;;  %v873_v36 = vadd.f32 %v872_v32, %v3799_v7  ;;  %v985_v38 = vpack.c.bf16 %v871_v26, %v867_v28  ;;  %1555 = vmatmul.mubr.bf16.gmra.mxu0 %v1171_v37 }
 0x115   : > { %v683_v40 = vpop.f32.mrf.mxu0  ;;  %v876_v41 = vpop.f32.mrf.mxu1  ;;  %1716 = vmatmul.mubr.bf16.gmra.mxu1 %v1173_v39 }
 0x116   : > { %v984_v42 = vpack.c.bf16 %v680_v35, %v676_v29  ;;  %v986_v43 = vpack.c.bf16 %v873_v36, %v869_v30  ;;  %v684_v46 = vadd.f32 %v683_v40, %v3793_v3  ;;  %v1111_v48 = vmul.bf16 1036860877, %v983_v34 }
 0x117   : > { %v685_v44 = vpop.f32.mrf.mxu0  ;;  %v878_v45 = vpop.f32.mrf.mxu1  ;;  %vm1047_vm15 = vcmp.gt.bf16.partialorder %v983_v34, 0  ;;  %v1113_v52 = vmul.bf16 1036860877, %v985_v38  ;;  %vm1049_vm0 = vcmp.gt.bf16.partialorder %v985_v38, 0  ;;  %v877_v56 = vadd.f32 %v876_v41, %v3795_v2 }
 0x118   : > { %vm1048_vm13 = vcmp.gt.bf16.partialorder %v984_v42, 0  ;;  %v1112_v47 = vmul.bf16 1036860877, %v984_v42  ;;  %vm1050_vm14 = vcmp.gt.bf16.partialorder %v986_v43, 0  ;;  %v1114_v51 = vmul.bf16 1036860877, %v986_v43 }
 0x119   : > { %v687_v49 = vpop.f32.mrf.mxu0  ;;  %v880_v50 = vpop.f32.mrf.mxu1  ;;  %v686_v57 = vadd.f32 %v685_v44, %v3797_v6  ;;  %v879_v58 = vadd.f32 %v878_v45, %v3799_v7  ;;  %v1175_v1 = vsel %vm1047_vm15, %v983_v34, %v1111_v48  ;;  %v1177_v5 = vsel %vm1049_vm0, %v985_v38, %v1113_v52 }
 0x11a   : > { %v688_v53 = vadd.f32 %v687_v49, %v3793_v3  ;;  %v881_v54 = vadd.f32 %v880_v50, %v3795_v2  ;;  %v1176_v55 = vsel %vm1048_vm13, %v984_v42, %v1112_v47  ;;  %v1178_v61 = vsel %vm1050_vm14, %v986_v43, %v1114_v51 }
 0x11b   : > { %v689_v59 = vpop.f32.mrf.mxu0  ;;  %v882_v60 = vpop.f32.mrf.mxu1  ;;  %1562 = vmatprep.mubr.bf16.mxu0 %v1176_v55  ;;  %1723 = vmatprep.mubr.bf16.mxu1 %v1178_v61 }
 0x11c   : > { %v987_v62 = vpack.c.bf16 %v688_v53, %v684_v46  ;;  %v690_v63 = vadd.f32 %v689_v59, %v3797_v6  ;;  %v883_v0 = vadd.f32 %v882_v60, %v3799_v7  ;;  %v989_v4 = vpack.c.bf16 %v881_v54, %v877_v56  ;;  %1563 = vmatmul.mubr.bf16.gmra.mxu0 %v1175_v1 }
 0x11d   : > { %v693_v8 = vpop.f32.mrf.mxu0  ;;  %v886_v9 = vpop.f32.mrf.mxu1  ;;  %1724 = vmatmul.mubr.bf16.gmra.mxu1 %v1177_v5 }
 0x11e   : > { %v988_v10 = vpack.c.bf16 %v690_v63, %v686_v57  ;;  %v990_v11 = vpack.c.bf16 %v883_v0, %v879_v58  ;;  %v694_v14 = vadd.f32 %v693_v8, %v3793_v3  ;;  %v1115_v16 = vmul.bf16 1036860877, %v987_v62 }
 0x11f   : > { %v695_v12 = vpop.f32.mrf.mxu0  ;;  %v888_v13 = vpop.f32.mrf.mxu1  ;;  %vm1051_vm3 = vcmp.gt.bf16.partialorder %v987_v62, 0  ;;  %v1117_v20 = vmul.bf16 1036860877, %v989_v4  ;;  %vm1053_vm4 = vcmp.gt.bf16.partialorder %v989_v4, 0  ;;  %v887_v24 = vadd.f32 %v886_v9, %v3795_v2 }
 0x120   : > { %vm1052_vm1 = vcmp.gt.bf16.partialorder %v988_v10, 0  ;;  %v1116_v15 = vmul.bf16 1036860877, %v988_v10  ;;  %vm1054_vm2 = vcmp.gt.bf16.partialorder %v990_v11, 0  ;;  %v1118_v19 = vmul.bf16 1036860877, %v990_v11 }
 0x121   : > { %v697_v17 = vpop.f32.mrf.mxu0  ;;  %v890_v18 = vpop.f32.mrf.mxu1  ;;  %v696_v25 = vadd.f32 %v695_v12, %v3797_v6  ;;  %v889_v26 = vadd.f32 %v888_v13, %v3799_v7  ;;  %v1179_v33 = vsel %vm1051_vm3, %v987_v62, %v1115_v16  ;;  %v1181_v35 = vsel %vm1053_vm4, %v989_v4, %v1117_v20 }
 0x122   : > { %v698_v21 = vadd.f32 %v697_v17, %v3793_v3  ;;  %v891_v22 = vadd.f32 %v890_v18, %v3795_v2  ;;  %v1180_v23 = vsel %vm1052_vm1, %v988_v10, %v1116_v15  ;;  %v1182_v29 = vsel %vm1054_vm2, %v990_v11, %v1118_v19 }
 0x123   : > { %v699_v27 = vpop.f32.mrf.mxu0  ;;  %v892_v28 = vpop.f32.mrf.mxu1  ;;  %1570 = vmatprep.mubr.bf16.mxu0 %v1180_v23  ;;  %1731 = vmatprep.mubr.bf16.mxu1 %v1182_v29 }
 0x124   : > { %v991_v30 = vpack.c.bf16 %v698_v21, %v694_v14  ;;  %v700_v31 = vadd.f32 %v699_v27, %v3797_v6  ;;  %v893_v32 = vadd.f32 %v892_v28, %v3799_v7  ;;  %v993_v34 = vpack.c.bf16 %v891_v22, %v887_v24  ;;  %1571 = vmatmul.mubr.bf16.gmra.mxu0 %v1179_v33 }
 0x125   : > { %v703_v36 = vpop.f32.mrf.mxu0  ;;  %v896_v37 = vpop.f32.mrf.mxu1  ;;  %1732 = vmatmul.mubr.bf16.gmra.mxu1 %v1181_v35 }
 0x126   : > { %v992_v38 = vpack.c.bf16 %v700_v31, %v696_v25  ;;  %v994_v39 = vpack.c.bf16 %v893_v32, %v889_v26  ;;  %v704_v42 = vadd.f32 %v703_v36, %v3793_v3  ;;  %v1119_v44 = vmul.bf16 1036860877, %v991_v30  ;;  %v3384_v36 = vld [vmem:[%s4501_s5 + $0x8] sm:$0xff]  }
 0x127   : > { %v705_v40 = vpop.f32.mrf.mxu0  ;;  %v898_v41 = vpop.f32.mrf.mxu1  ;;  %vm1055_vm7 = vcmp.gt.bf16.partialorder %v991_v30, 0  ;;  %v1121_v48 = vmul.bf16 1036860877, %v993_v34  ;;  %vm1057_vm8 = vcmp.gt.bf16.partialorder %v993_v34, 0  ;;  %v897_v52 = vadd.f32 %v896_v37, %v3795_v2  ;;  %3243 = vmatprep.subr.bf16.mxu0 %v3384_v36 }
 0x128   : > { %vm1056_vm5 = vcmp.gt.bf16.partialorder %v992_v38, 0  ;;  %v1120_v43 = vmul.bf16 1036860877, %v992_v38  ;;  %vm1058_vm6 = vcmp.gt.bf16.partialorder %v994_v39, 0  ;;  %v1122_v47 = vmul.bf16 1036860877, %v994_v39  ;;  %3244 = vmatpush3.bf16.msra.mxu0 %v3384_v36 }
 0x129   : > { %v707_v45 = vpop.f32.mrf.mxu0  ;;  %v900_v46 = vpop.f32.mrf.mxu1  ;;  %v706_v53 = vadd.f32 %v705_v40, %v3797_v6  ;;  %v899_v54 = vadd.f32 %v898_v41, %v3799_v7  ;;  %v1183_v61 = vsel %vm1055_vm7, %v991_v30, %v1119_v44  ;;  %v1185_v63 = vsel %vm1057_vm8, %v993_v34, %v1121_v48 }
 0x12a   : > { %v708_v49 = vadd.f32 %v707_v45, %v3793_v3  ;;  %v901_v50 = vadd.f32 %v900_v46, %v3795_v2  ;;  %v1184_v51 = vsel %vm1056_vm5, %v992_v38, %v1120_v43  ;;  %v1186_v57 = vsel %vm1058_vm6, %v994_v39, %v1122_v47 }
 0x12b   : > { %v709_v55 = vpop.f32.mrf.mxu0  ;;  %v902_v56 = vpop.f32.mrf.mxu1  ;;  %1578 = vmatprep.mubr.bf16.mxu0 %v1184_v51  ;;  %1739 = vmatprep.mubr.bf16.mxu1 %v1186_v57 }
 0x12c   : > { %v995_v58 = vpack.c.bf16 %v708_v49, %v704_v42  ;;  %v710_v59 = vadd.f32 %v709_v55, %v3797_v6  ;;  %v903_v60 = vadd.f32 %v902_v56, %v3799_v7  ;;  %v997_v62 = vpack.c.bf16 %v901_v50, %v897_v52  ;;  %1579 = vmatmul.mubr.bf16.gmra.mxu0 %v1183_v61  ;;  %v3385_v50 = vld [vmem:[%s4501_s5] sm:$0xff]  }
 0x12d   : > { %v713_v0 = vpop.f32.mrf.mxu0  ;;  %v906_v1 = vpop.f32.mrf.mxu1  ;;  %1740 = vmatmul.mubr.bf16.gmra.mxu1 %v1185_v63  ;;  %3245 = vmatprep.subr.bf16.mxu0 %v3385_v50 }
 0x12e   : > { %v996_v4 = vpack.c.bf16 %v710_v59, %v706_v53  ;;  %v998_v5 = vpack.c.bf16 %v903_v60, %v899_v54  ;;  %v714_v10 = vadd.f32 %v713_v0, %v3793_v3  ;;  %v1123_v12 = vmul.bf16 1036860877, %v995_v58  ;;  %3246 = vmatpush3.bf16.msra.mxu0 %v3385_v50 }
 0x12f   : > { %v715_v8 = vpop.f32.mrf.mxu0  ;;  %v908_v9 = vpop.f32.mrf.mxu1  ;;  %vm1059_vm11 = vcmp.gt.bf16.partialorder %v995_v58, 0  ;;  %v1125_v16 = vmul.bf16 1036860877, %v997_v62  ;;  %vm1061_vm12 = vcmp.gt.bf16.partialorder %v997_v62, 0  ;;  %v907_v20 = vadd.f32 %v906_v1, %v3795_v2 }
 0x130   : > { %vm1060_vm9 = vcmp.gt.bf16.partialorder %v996_v4, 0  ;;  %v1124_v11 = vmul.bf16 1036860877, %v996_v4  ;;  %vm1062_vm10 = vcmp.gt.bf16.partialorder %v998_v5, 0  ;;  %v1126_v15 = vmul.bf16 1036860877, %v998_v5 }
 0x131   : > { %v717_v13 = vpop.f32.mrf.mxu0  ;;  %v910_v14 = vpop.f32.mrf.mxu1  ;;  %v716_v21 = vadd.f32 %v715_v8, %v3797_v6  ;;  %v909_v22 = vadd.f32 %v908_v9, %v3799_v7  ;;  %v1187_v29 = vsel %vm1059_vm11, %v995_v58, %v1123_v12  ;;  %v1189_v31 = vsel %vm1061_vm12, %v997_v62, %v1125_v16 }
 0x132   : > { %v718_v17 = vadd.f32 %v717_v13, %v3793_v3  ;;  %v911_v18 = vadd.f32 %v910_v14, %v3795_v2  ;;  %v1188_v19 = vsel %vm1060_vm9, %v996_v4, %v1124_v11  ;;  %v1190_v25 = vsel %vm1062_vm10, %v998_v5, %v1126_v15 }
 0x133   : > { %v719_v23 = vpop.f32.mrf.mxu0  ;;  %v912_v24 = vpop.f32.mrf.mxu1  ;;  %1586 = vmatprep.mubr.bf16.mxu0 %v1188_v19  ;;  %1747 = vmatprep.mubr.bf16.mxu1 %v1190_v25 }
 0x134   : > { %v999_v26 = vpack.c.bf16 %v718_v17, %v714_v10  ;;  %v720_v27 = vadd.f32 %v719_v23, %v3797_v6  ;;  %v913_v28 = vadd.f32 %v912_v24, %v3799_v7  ;;  %v1001_v30 = vpack.c.bf16 %v911_v18, %v907_v20  ;;  %1587 = vmatmul.mubr.bf16.gmra.mxu0 %v1187_v29 }
 0x135   : > { %v723_v32 = vpop.f32.mrf.mxu0  ;;  %v916_v33 = vpop.f32.mrf.mxu1  ;;  %1748 = vmatmul.mubr.bf16.gmra.mxu1 %v1189_v31 }
 0x136   : > { %v1000_v34 = vpack.c.bf16 %v720_v27, %v716_v21  ;;  %v1002_v35 = vpack.c.bf16 %v913_v28, %v909_v22  ;;  %v1127_v39 = vmul.bf16 1036860877, %v999_v26  ;;  %v724_v40 = vadd.f32 %v723_v32, %v3793_v3 }
 0x137   : > { %v725_v37 = vpop.f32.mrf.mxu0  ;;  %v918_v38 = vpop.f32.mrf.mxu1  ;;  %vm1063_vm14 = vcmp.gt.bf16.partialorder %v999_v26, 0  ;;  %v917_v42 = vadd.f32 %v916_v33, %v3795_v2  ;;  %v1129_v46 = vmul.bf16 1036860877, %v1001_v30  ;;  %vm1065_vm0 = vcmp.gt.bf16.partialorder %v1001_v30, 0 }
 0x138   : > { %vm1064_vm13 = vcmp.gt.bf16.partialorder %v1000_v34, 0  ;;  %v1128_v41 = vmul.bf16 1036860877, %v1000_v34  ;;  %vm1066_vm15 = vcmp.gt.bf16.partialorder %v1002_v35, 0  ;;  %v1130_v45 = vmul.bf16 1036860877, %v1002_v35 }
 0x139   : > { %v727_v43 = vpop.f32.mrf.mxu0  ;;  %v920_v44 = vpop.f32.mrf.mxu1  ;;  %v726_v51 = vadd.f32 %v725_v37, %v3797_v6  ;;  %v919_v52 = vadd.f32 %v918_v38, %v3799_v7  ;;  %v1191_v56 = vsel %vm1063_vm14, %v999_v26, %v1127_v39  ;;  %v1193_v61 = vsel %vm1065_vm0, %v1001_v30, %v1129_v46 }
 0x13a   : > { %v728_v47 = vadd.f32 %v727_v43, %v3793_v3  ;;  %v921_v48 = vadd.f32 %v920_v44, %v3795_v2  ;;  %v1192_v49 = vsel %vm1064_vm13, %v1000_v34, %v1128_v41  ;;  %v1194_v55 = vsel %vm1066_vm15, %v1002_v35, %v1130_v45 }
 0x13b   : > { %v729_v53 = vpop.f32.mrf.mxu0  ;;  %v922_v54 = vpop.f32.mrf.mxu1  ;;  %1594 = vmatprep.mubr.bf16.mxu0 %v1192_v49  ;;  %1755 = vmatprep.mubr.bf16.mxu1 %v1194_v55 }
 0x13c   : > { %v1003_v57 = vpack.c.bf16 %v728_v47, %v724_v40  ;;  %v1005_v58 = vpack.c.bf16 %v921_v48, %v917_v42  ;;  %v730_v59 = vadd.f32 %v729_v53, %v3797_v6  ;;  %v923_v60 = vadd.f32 %v922_v54, %v3799_v7  ;;  %1595 = vmatmul.mubr.bf16.gmra.mxu0 %v1191_v56 }
 0x13d   : > { %v733_v62 = vpop.f32.mrf.mxu0  ;;  %v926_v63 = vpop.f32.mrf.mxu1  ;;  %1756 = vmatmul.mubr.bf16.gmra.mxu1 %v1193_v61 }
 0x13e   : > { %v1004_v0 = vpack.c.bf16 %v730_v59, %v726_v51  ;;  %v1006_v1 = vpack.c.bf16 %v923_v60, %v919_v52  ;;  %v1131_v4 = vmul.bf16 1036860877, %v1003_v57  ;;  %v1133_v9 = vmul.bf16 1036860877, %v1005_v58 }
 0x13f   : > { %v735_v5 = vpop.f32.mrf.mxu0  ;;  %v928_v8 = vpop.f32.mrf.mxu1  ;;  %vm1067_vm2 = vcmp.gt.bf16.partialorder %v1003_v57, 0  ;;  %v734_v11 = vadd.f32 %v733_v62, %v3793_v3  ;;  %v927_v12 = vadd.f32 %v926_v63, %v3795_v2  ;;  %vm1069_vm4 = vcmp.gt.bf16.partialorder %v1005_v58, 0 }
 0x140   : > { %vm1068_vm1 = vcmp.gt.bf16.partialorder %v1004_v0, 0  ;;  %v1132_v10 = vmul.bf16 1036860877, %v1004_v0  ;;  %vm1070_vm3 = vcmp.gt.bf16.partialorder %v1006_v1, 0  ;;  %v1134_v15 = vmul.bf16 1036860877, %v1006_v1 }
 0x141   : > { %v737_v13 = vpop.f32.mrf.mxu0  ;;  %v930_v14 = vpop.f32.mrf.mxu1  ;;  %v736_v19 = vadd.f32 %v735_v5, %v3797_v6  ;;  %v929_v20 = vadd.f32 %v928_v8, %v3799_v7  ;;  %v1195_v24 = vsel %vm1067_vm2, %v1003_v57, %v1131_v4  ;;  %v1197_v29 = vsel %vm1069_vm4, %v1005_v58, %v1133_v9 }
 0x142   : > { %v738_v16 = vadd.f32 %v737_v13, %v3793_v3  ;;  %v931_v17 = vadd.f32 %v930_v14, %v3795_v2  ;;  %v1196_v18 = vsel %vm1068_vm1, %v1004_v0, %v1132_v10  ;;  %v1198_v23 = vsel %vm1070_vm3, %v1006_v1, %v1134_v15 }
 0x143   : > { %v739_v21 = vpop.f32.mrf.mxu0  ;;  %v932_v22 = vpop.f32.mrf.mxu1  ;;  %1602 = vmatprep.mubr.bf16.mxu0 %v1196_v18  ;;  %1763 = vmatprep.mubr.bf16.mxu1 %v1198_v23  ;;  %vm1899_vm1 = vcmask 523264  }
 0x144   : > { %v1007_v25 = vpack.c.bf16 %v738_v16, %v734_v11  ;;  %v1009_v26 = vpack.c.bf16 %v931_v17, %v927_v12  ;;  %v740_v27 = vadd.f32 %v739_v21, %v3797_v6  ;;  %v933_v28 = vadd.f32 %v932_v22, %v3799_v7  ;;  %1603 = vmatmul.mubr.bf16.gmra.mxu0 %v1195_v24 }
 0x145   : > { %v743_v30 = vpop.f32.mrf.mxu0  ;;  %v936_v31 = vpop.f32.mrf.mxu1  ;;  %1764 = vmatmul.mubr.bf16.gmra.mxu1 %v1197_v29 }
 0x146   : > { %v1008_v32 = vpack.c.bf16 %v740_v27, %v736_v19  ;;  %v1010_v33 = vpack.c.bf16 %v933_v28, %v929_v20  ;;  %v1135_v34 = vmul.bf16 1036860877, %v1007_v25  ;;  %v1137_v37 = vmul.bf16 1036860877, %v1009_v26 }
 0x147   : > { %v745_v35 = vpop.f32.mrf.mxu0  ;;  %v938_v36 = vpop.f32.mrf.mxu1  ;;  %vm1071_vm6 = vcmp.gt.bf16.partialorder %v1007_v25, 0  ;;  %v744_v39 = vadd.f32 %v743_v30, %v3793_v3  ;;  %v937_v40 = vadd.f32 %v936_v31, %v3795_v2  ;;  %vm1073_vm8 = vcmp.gt.bf16.partialorder %v1009_v26, 0 }
 0x148   : > { %vm1072_vm5 = vcmp.gt.bf16.partialorder %v1008_v32, 0  ;;  %v1136_v38 = vmul.bf16 1036860877, %v1008_v32  ;;  %vm1074_vm7 = vcmp.gt.bf16.partialorder %v1010_v33, 0  ;;  %v1138_v43 = vmul.bf16 1036860877, %v1010_v33 }
 0x149   : > { %v747_v41 = vpop.f32.mrf.mxu0  ;;  %v940_v42 = vpop.f32.mrf.mxu1  ;;  %v746_v47 = vadd.f32 %v745_v35, %v3797_v6  ;;  %v939_v48 = vadd.f32 %v938_v36, %v3799_v7  ;;  %v1199_v52 = vsel %vm1071_vm6, %v1007_v25, %v1135_v34  ;;  %v1201_v57 = vsel %vm1073_vm8, %v1009_v26, %v1137_v37  ;;  %v3960_v37 = vld [vmem:[%s4500_s4] ss:$0 sm:$0xff] }
 0x14a   : > { %v748_v44 = vadd.f32 %v747_v41, %v3793_v3  ;;  %v941_v45 = vadd.f32 %v940_v42, %v3795_v2  ;;  %v1200_v46 = vsel %vm1072_vm5, %v1008_v32, %v1136_v38  ;;  %v1202_v51 = vsel %vm1074_vm7, %v1010_v33, %v1138_v43 }
 0x14b   : > { %v749_v49 = vpop.f32.mrf.mxu0  ;;  %v942_v50 = vpop.f32.mrf.mxu1  ;;  %1610 = vmatprep.mubr.bf16.mxu0 %v1200_v46  ;;  %1771 = vmatprep.mubr.bf16.mxu1 %v1202_v51 }
 0x14c   : > { %v1011_v53 = vpack.c.bf16 %v748_v44, %v744_v39  ;;  %v1013_v54 = vpack.c.bf16 %v941_v45, %v937_v40  ;;  %v750_v55 = vadd.f32 %v749_v49, %v3797_v6  ;;  %v943_v56 = vadd.f32 %v942_v50, %v3799_v7  ;;  %1611 = vmatmul.mubr.bf16.gmra.mxu0 %v1199_v52  ;;  %v3386_v50 = vld [vmem:[%s4503_s7] sm:$0xff]  }
 0x14d   : > { %v753_v58 = vpop.f32.mrf.mxu0  ;;  %v946_v59 = vpop.f32.mrf.mxu1  ;;  %1772 = vmatmul.mubr.bf16.gmra.mxu1 %v1201_v57  ;;  %3279 = vmatprep.subr.bf16.mxu1 %v3386_v50 }
 0x14e   : > { %v1012_v60 = vpack.c.bf16 %v750_v55, %v746_v47  ;;  %v1014_v61 = vpack.c.bf16 %v943_v56, %v939_v48  ;;  %v1139_v62 = vmul.bf16 1036860877, %v1011_v53  ;;  %v1141_v1 = vmul.bf16 1036860877, %v1013_v54  ;;  %3280 = vmatpush3.bf16.msra.mxu1 %v3386_v50 }
 0x14f   : > { %v755_v63 = vpop.f32.mrf.mxu0  ;;  %v948_v0 = vpop.f32.mrf.mxu1  ;;  %v754_v5 = vadd.f32 %v753_v58, %v3793_v3  ;;  %vm1075_vm11 = vcmp.gt.bf16.partialorder %v1011_v53, 0  ;;  %vm1077_vm12 = vcmp.gt.bf16.partialorder %v1013_v54, 0  ;;  %v947_v14 = vadd.f32 %v946_v59, %v3795_v2 }
 0x150   : > { %vm1076_vm9 = vcmp.gt.bf16.partialorder %v1012_v60, 0  ;;  %v1140_v4 = vmul.bf16 1036860877, %v1012_v60  ;;  %vm1078_vm10 = vcmp.gt.bf16.partialorder %v1014_v61, 0  ;;  %v1142_v10 = vmul.bf16 1036860877, %v1014_v61 }
 0x151   : > { %v757_v8 = vpop.f32.mrf.mxu0  ;;  %v950_v9 = vpop.f32.mrf.mxu1  ;;  %v756_v15 = vadd.f32 %v755_v63, %v3797_v6  ;;  %v949_v16 = vadd.f32 %v948_v0, %v3799_v7  ;;  %v1205_v24 = vsel %vm1077_vm12, %v1013_v54, %v1141_v1 }
 0x152   : > { %v758_v11 = vadd.f32 %v757_v8, %v3793_v3  ;;  %v951_v12 = vadd.f32 %v950_v9, %v3795_v2  ;;  %v1204_v13 = vsel %vm1076_vm9, %v1012_v60, %v1140_v4  ;;  %v1206_v19 = vsel %vm1078_vm10, %v1014_v61, %v1142_v10 }
 0x153   : > { %v759_v17 = vpop.f32.mrf.mxu0  ;;  %v952_v18 = vpop.f32.mrf.mxu1  ;;  %1618 = vmatprep.mubr.bf16.mxu0 %v1204_v13  ;;  %1779 = vmatprep.mubr.bf16.mxu1 %v1206_v19  ;;  %v1203_v3 = vsel %vm1075_vm11, %v1011_v53, %v1139_v62 }
 0x154   : > { %v1015_v20 = vpack.c.bf16 %v758_v11, %v754_v5  ;;  %v760_v21 = vadd.f32 %v759_v17, %v3797_v6  ;;  %v953_v22 = vadd.f32 %v952_v18, %v3799_v7  ;;  %v1017_v23 = vpack.c.bf16 %v951_v12, %v947_v14  ;;  %1619 = vmatmul.mubr.bf16.gmra.mxu0 %v1203_v3 }
 0x155   : > { %1780 = vmatmul.mubr.bf16.gmra.mxu1 %v1205_v24 }
 0x156   : > { %v1016_v2 = vpack.c.bf16 %v760_v21, %v756_v15  ;;  %v1018_v25 = vpack.c.bf16 %v953_v22, %v949_v16  ;;  %v1143_v26 = vmul.bf16 1036860877, %v1015_v20  ;;  %v1145_v29 = vmul.bf16 1036860877, %v1017_v23 }
 0x157   : > { %vm1079_vm15 = vcmp.gt.bf16.partialorder %v1015_v20, 0  ;;  %vm1081_vm0 = vcmp.gt.bf16.partialorder %v1017_v23, 0 }
 0x158   : > { %vm1080_vm13 = vcmp.gt.bf16.partialorder %v1016_v2, 0  ;;  %v1144_v27 = vmul.bf16 1036860877, %v1016_v2  ;;  %vm1082_vm14 = vcmp.gt.bf16.partialorder %v1018_v25, 0  ;;  %v1146_v28 = vmul.bf16 1036860877, %v1018_v25 }
 0x159   : > { %v1207_v7 = vsel %vm1079_vm15, %v1015_v20, %v1143_v26  ;;  %v1209_v31 = vsel %vm1081_vm0, %v1017_v23, %v1145_v29 }
 0x15a   : > { %v1208_v30 = vsel %vm1080_vm13, %v1016_v2, %v1144_v27  ;;  %v1210_v6 = vsel %vm1082_vm14, %v1018_v25, %v1146_v28 }
 0x15b   : > { %1626 = vmatprep.mubr.bf16.mxu0 %v1208_v30  ;;  %1787 = vmatprep.mubr.bf16.mxu1 %v1210_v6 }
 0x15c   : > { %1627 = vmatmul.mubr.bf16.gmra.mxu0 %v1207_v7 }
 0x15d   : > { %1788 = vmatmul.mubr.bf16.gmra.mxu1 %v1209_v31 }
 0x1a4   : > { %v2994_v32 = vpop.f32.mrf.mxu0 }
 0x1a5   : > { %v3106_v33 = vpop.f32.mrf.mxu1 }
 0x1a6   : > { %v2995_v34 = vpop.f32.mrf.mxu0 }
 0x1a7   : > { %v2996_v35 = vadd.f32 %v2995_v34, %v2994_v32  ;;  %v3107_v36 = vpop.f32.mrf.mxu1 }
 0x1a8   : > { %v2997_v38 = vpop.f32.mrf.mxu0  ;;  %v3108_v45 = vadd.f32 %v3107_v36, %v3106_v33 }
 0x1a9   : > { %v3109_v39 = vpop.f32.mrf.mxu1  ;;  %v1509_v41 = vadd.f32 %v2996_v35, %v3960_v37 }
 0x1aa   : > { %v2998_v40 = vpop.f32.mrf.mxu0 }
 0x1ab   : > { %v2999_v42 = vadd.f32 %v2998_v40, %v2997_v38  ;;  %v3110_v43 = vpop.f32.mrf.mxu1  ;;  %v1670_v51 = vadd.f32 %v3108_v45, %v1509_v41 }
 0x1ac   : > { %v3000_v44 = vpop.f32.mrf.mxu0  ;;  %v3111_v47 = vadd.f32 %v3110_v43, %v3109_v39 }
 0x1ad   : > { %v1512_v46 = vadd.f32 %v2999_v42, %v3960_v37  ;;  %v3112_v48 = vpop.f32.mrf.mxu1 }
 0x1ae   : > { %v3001_v49 = vpop.f32.mrf.mxu0 }
 0x1af   : > { %v1673_v52 = vadd.f32 %v3111_v47, %v1512_v46  ;;  %v3002_v53 = vadd.f32 %v3001_v49, %v3000_v44  ;;  %v3113_v54 = vpop.f32.mrf.mxu1 }
 0x1b0   : > { %v3003_v55 = vpop.f32.mrf.mxu0  ;;  %v3114_v0 = vadd.f32 %v3113_v54, %v3112_v48 }
 0x1b1   : > { %v1796_v56 = vpack.c.bf16 %v1673_v52, %v1670_v51  ;;  %v3115_v57 = vpop.f32.mrf.mxu1  ;;  %v1517_v59 = vadd.f32 %v3002_v53, %v3960_v37 }
 0x1b2   : > { %v3004_v58 = vpop.f32.mrf.mxu0 }
 0x1b3   : > { %v3005_v60 = vadd.f32 %v3004_v58, %v3003_v55  ;;  %v3116_v61 = vpop.f32.mrf.mxu1  ;;  %vm1812_vm2 = vcmp.gt.bf16.partialorder %v1796_v56, 0  ;;  %v1828_v62 = vmul.bf16 1036860877, %v1796_v56  ;;  %v1678_v10 = vadd.f32 %v3114_v0, %v1517_v59 }
 0x1b4   : > { %v3006_v63 = vpop.f32.mrf.mxu0  ;;  %v3117_v4 = vadd.f32 %v3116_v61, %v3115_v57 }
 0x1b5   : > { %v1520_v1 = vadd.f32 %v3005_v60, %v3960_v37  ;;  %v3118_v5 = vpop.f32.mrf.mxu1  ;;  %v1844_v8 = vsel %vm1812_vm2, %v1796_v56, %v1828_v62 }
 0x1b6   : > { %v3007_v9 = vpop.f32.mrf.mxu0  ;;  %3247 = vmatprep.mubr.msk.bf16.mxu0 %vm1899_vm1, %v1844_v8 }
 0x1b7   : > { %v1681_v11 = vadd.f32 %v3117_v4, %v1520_v1  ;;  %v3008_v12 = vadd.f32 %v3007_v9, %v3006_v63  ;;  %v3119_v13 = vpop.f32.mrf.mxu1 }
 0x1b8   : > { %v3009_v14 = vpop.f32.mrf.mxu0  ;;  %v3120_v23 = vadd.f32 %v3119_v13, %v3118_v5 }
 0x1b9   : > { %v1797_v15 = vpack.c.bf16 %v1681_v11, %v1678_v10  ;;  %v3121_v16 = vpop.f32.mrf.mxu1  ;;  %v1525_v19 = vadd.f32 %v3008_v12, %v3960_v37 }
 0x1ba   : > { %v3010_v17 = vpop.f32.mrf.mxu0 }
 0x1bb   : > { %vm1813_vm3 = vcmp.gt.bf16.partialorder %v1797_v15, 0  ;;  %v1829_v18 = vmul.bf16 1036860877, %v1797_v15  ;;  %v3011_v20 = vadd.f32 %v3010_v17, %v3009_v14  ;;  %v3122_v21 = vpop.f32.mrf.mxu1  ;;  %v1686_v27 = vadd.f32 %v3120_v23, %v1525_v19 }
 0x1bc   : > { %v3012_v22 = vpop.f32.mrf.mxu0  ;;  %v3123_v2 = vadd.f32 %v3122_v21, %v3121_v16 }
 0x1bd   : > { %v1845_v3 = vsel %vm1813_vm3, %v1797_v15, %v1829_v18  ;;  %v1528_v24 = vadd.f32 %v3011_v20, %v3960_v37  ;;  %v3124_v25 = vpop.f32.mrf.mxu1 }
 0x1be   : > { %v3013_v26 = vpop.f32.mrf.mxu0  ;;  %3248 = vmatmul.mubr.msk.bf16.vlgmr.msra.gmra.mxu0 %vm1899_vm1, %v1845_v3 }
 0x1bf   : > { %v1689_v28 = vadd.f32 %v3123_v2, %v1528_v24  ;;  %v3014_v29 = vadd.f32 %v3013_v26, %v3012_v22  ;;  %v3125_v30 = vpop.f32.mrf.mxu1 }
 0x1c0   : > { %v3015_v6 = vpop.f32.mrf.mxu0  ;;  %v3126_v39 = vadd.f32 %v3125_v30, %v3124_v25 }
 0x1c1   : > { %v1798_v7 = vpack.c.bf16 %v1689_v28, %v1686_v27  ;;  %v3127_v31 = vpop.f32.mrf.mxu1  ;;  %v1533_v33 = vadd.f32 %v3014_v29, %v3960_v37 }
 0x1c2   : > { %v3016_v32 = vpop.f32.mrf.mxu0 }
 0x1c3   : > { %v3017_v34 = vadd.f32 %v3016_v32, %v3015_v6  ;;  %v3128_v35 = vpop.f32.mrf.mxu1  ;;  %vm1814_vm4 = vcmp.gt.bf16.partialorder %v1798_v7, 0  ;;  %v1830_v36 = vmul.bf16 1036860877, %v1798_v7  ;;  %v1694_v45 = vadd.f32 %v3126_v39, %v1533_v33 }
 0x1c4   : > { %v3018_v38 = vpop.f32.mrf.mxu0  ;;  %v3129_v41 = vadd.f32 %v3128_v35, %v3127_v31 }
 0x1c5   : > { %v1536_v40 = vadd.f32 %v3017_v34, %v3960_v37  ;;  %v3130_v42 = vpop.f32.mrf.mxu1  ;;  %v1846_v43 = vsel %vm1814_vm4, %v1798_v7, %v1830_v36  ;;  %vm2188_vm4 = vcmask 130048  }
 0x1c6   : > { %v3019_v44 = vpop.f32.mrf.mxu0  ;;  %3251 = vmatprep.mubr.msk.bf16.mxu0 %vm1899_vm1, %v1846_v43 }
 0x1c7   : > { %v1697_v46 = vadd.f32 %v3129_v41, %v1536_v40  ;;  %v3020_v47 = vadd.f32 %v3019_v44, %v3018_v38  ;;  %v3131_v48 = vpop.f32.mrf.mxu1 }
 0x1c8   : > { %v3021_v49 = vpop.f32.mrf.mxu0  ;;  %v3132_v58 = vadd.f32 %v3131_v48, %v3130_v42 }
 0x1c9   : > { %v1799_v50 = vpack.c.bf16 %v1697_v46, %v1694_v45  ;;  %v3133_v51 = vpop.f32.mrf.mxu1  ;;  %v1541_v54 = vadd.f32 %v3020_v47, %v3960_v37 }
 0x1ca   : > { %v3022_v52 = vpop.f32.mrf.mxu0 }
 0x1cb   : > { %v1831_v53 = vmul.bf16 1036860877, %v1799_v50  ;;  %v3023_v55 = vadd.f32 %v3022_v52, %v3021_v49  ;;  %v3134_v56 = vpop.f32.mrf.mxu1  ;;  %vm1815_vm5 = vcmp.gt.bf16.partialorder %v1799_v50, 0  ;;  %v1702_v0 = vadd.f32 %v3132_v58, %v1541_v54 }
 0x1cc   : > { %v3024_v57 = vpop.f32.mrf.mxu0  ;;  %v3135_v60 = vadd.f32 %v3134_v56, %v3133_v51 }
 0x1cd   : > { %v1544_v59 = vadd.f32 %v3023_v55, %v3960_v37  ;;  %v3136_v61 = vpop.f32.mrf.mxu1  ;;  %v1847_v62 = vsel %vm1815_vm5, %v1799_v50, %v1831_v53 }
 0x1ce   : > { %v3025_v63 = vpop.f32.mrf.mxu0  ;;  %3252 = vmatmul.mubr.msk.bf16.gmra.mxu0 %vm1899_vm1, %v1847_v62 }
 0x1cf   : > { %v1705_v1 = vadd.f32 %v3135_v60, %v1544_v59  ;;  %v3026_v4 = vadd.f32 %v3025_v63, %v3024_v57  ;;  %v3137_v5 = vpop.f32.mrf.mxu1 }
 0x1d0   : > { %v3027_v8 = vpop.f32.mrf.mxu0  ;;  %v3138_v17 = vadd.f32 %v3137_v5, %v3136_v61 }
 0x1d1   : > { %v1800_v9 = vpack.c.bf16 %v1705_v1, %v1702_v0  ;;  %v3139_v10 = vpop.f32.mrf.mxu1  ;;  %v1549_v12 = vadd.f32 %v3026_v4, %v3960_v37 }
 0x1d2   : > { %v3028_v11 = vpop.f32.mrf.mxu0 }
 0x1d3   : > { %v3029_v13 = vadd.f32 %v3028_v11, %v3027_v8  ;;  %v3140_v14 = vpop.f32.mrf.mxu1  ;;  %vm1816_vm6 = vcmp.gt.bf16.partialorder %v1800_v9, 0  ;;  %v1832_v15 = vmul.bf16 1036860877, %v1800_v9  ;;  %v1710_v3 = vadd.f32 %v3138_v17, %v1549_v12 }
 0x1d4   : > { %v3030_v16 = vpop.f32.mrf.mxu0  ;;  %v3141_v19 = vadd.f32 %v3140_v14, %v3139_v10 }
 0x1d5   : > { %v1552_v18 = vadd.f32 %v3029_v13, %v3960_v37  ;;  %v3142_v20 = vpop.f32.mrf.mxu1  ;;  %v1848_v21 = vsel %vm1816_vm6, %v1800_v9, %v1832_v15 }
 0x1d6   : > { %v3031_v22 = vpop.f32.mrf.mxu0  ;;  %3255 = vmatprep.mubr.msk.bf16.mxu0 %vm1899_vm1, %v1848_v21 }
 0x1d7   : > { %v1713_v23 = vadd.f32 %v3141_v19, %v1552_v18  ;;  %v3032_v24 = vadd.f32 %v3031_v22, %v3030_v16  ;;  %v3143_v2 = vpop.f32.mrf.mxu1 }
 0x1d8   : > { %v3033_v25 = vpop.f32.mrf.mxu0  ;;  %v3144_v32 = vadd.f32 %v3143_v2, %v3142_v20 }
 0x1d9   : > { %v1801_v26 = vpack.c.bf16 %v1713_v23, %v1710_v3  ;;  %v3145_v27 = vpop.f32.mrf.mxu1  ;;  %v1557_v30 = vadd.f32 %v3032_v24, %v3960_v37 }
 0x1da   : > { %v3034_v28 = vpop.f32.mrf.mxu0 }
 0x1db   : > { %v1833_v29 = vmul.bf16 1036860877, %v1801_v26  ;;  %v3035_v6 = vadd.f32 %v3034_v28, %v3033_v25  ;;  %v3146_v7 = vpop.f32.mrf.mxu1  ;;  %vm1817_vm7 = vcmp.gt.bf16.partialorder %v1801_v26, 0  ;;  %v1718_v39 = vadd.f32 %v3144_v32, %v1557_v30 }
 0x1dc   : > { %v3036_v31 = vpop.f32.mrf.mxu0  ;;  %v3147_v34 = vadd.f32 %v3146_v7, %v3145_v27 }
 0x1dd   : > { %v1560_v33 = vadd.f32 %v3035_v6, %v3960_v37  ;;  %v3148_v35 = vpop.f32.mrf.mxu1  ;;  %v1849_v36 = vsel %vm1817_vm7, %v1801_v26, %v1833_v29 }
 0x1de   : > { %v3037_v38 = vpop.f32.mrf.mxu0  ;;  %3256 = vmatmul.mubr.msk.bf16.gmra.mxu0 %vm1899_vm1, %v1849_v36 }
 0x1df   : > { %v1721_v40 = vadd.f32 %v3147_v34, %v1560_v33  ;;  %v3038_v41 = vadd.f32 %v3037_v38, %v3036_v31  ;;  %v3149_v42 = vpop.f32.mrf.mxu1 }
 0x1e0   : > { %v3039_v43 = vpop.f32.mrf.mxu0  ;;  %v3150_v52 = vadd.f32 %v3149_v42, %v3148_v35 }
 0x1e1   : > { %v1802_v44 = vpack.c.bf16 %v1721_v40, %v1718_v39  ;;  %v3151_v45 = vpop.f32.mrf.mxu1  ;;  %v1565_v47 = vadd.f32 %v3038_v41, %v3960_v37 }
 0x1e2   : > { %v3040_v46 = vpop.f32.mrf.mxu0 }
 0x1e3   : > { %v3041_v48 = vadd.f32 %v3040_v46, %v3039_v43  ;;  %v3152_v49 = vpop.f32.mrf.mxu1  ;;  %vm1818_vm8 = vcmp.gt.bf16.partialorder %v1802_v44, 0  ;;  %v1834_v50 = vmul.bf16 1036860877, %v1802_v44  ;;  %v1726_v58 = vadd.f32 %v3150_v52, %v1565_v47 }
 0x1e4   : > { %v3042_v51 = vpop.f32.mrf.mxu0  ;;  %v3153_v54 = vadd.f32 %v3152_v49, %v3151_v45 }
 0x1e5   : > { %v1568_v53 = vadd.f32 %v3041_v48, %v3960_v37  ;;  %v3154_v55 = vpop.f32.mrf.mxu1  ;;  %v1850_v56 = vsel %vm1818_vm8, %v1802_v44, %v1834_v50 }
 0x1e6   : > { %v3043_v57 = vpop.f32.mrf.mxu0  ;;  %3259 = vmatprep.mubr.msk.bf16.mxu0 %vm1899_vm1, %v1850_v56 }
 0x1e7   : > { %v1729_v59 = vadd.f32 %v3153_v54, %v1568_v53  ;;  %v3044_v60 = vadd.f32 %v3043_v57, %v3042_v51  ;;  %v3155_v61 = vpop.f32.mrf.mxu1 }
 0x1e8   : > { %v3045_v62 = vpop.f32.mrf.mxu0  ;;  %v3156_v11 = vadd.f32 %v3155_v61, %v3154_v55 }
 0x1e9   : > { %v1803_v63 = vpack.c.bf16 %v1729_v59, %v1726_v58  ;;  %v3157_v0 = vpop.f32.mrf.mxu1  ;;  %v1573_v5 = vadd.f32 %v3044_v60, %v3960_v37 }
 0x1ea   : > { %v3046_v1 = vpop.f32.mrf.mxu0 }
 0x1eb   : > { %v1835_v4 = vmul.bf16 1036860877, %v1803_v63  ;;  %v3047_v8 = vadd.f32 %v3046_v1, %v3045_v62  ;;  %v3158_v9 = vpop.f32.mrf.mxu1  ;;  %vm1819_vm9 = vcmp.gt.bf16.partialorder %v1803_v63, 0  ;;  %v1734_v17 = vadd.f32 %v3156_v11, %v1573_v5 }
 0x1ec   : > { %v3048_v10 = vpop.f32.mrf.mxu0  ;;  %v3159_v13 = vadd.f32 %v3158_v9, %v3157_v0 }
 0x1ed   : > { %v1576_v12 = vadd.f32 %v3047_v8, %v3960_v37  ;;  %v3160_v14 = vpop.f32.mrf.mxu1  ;;  %v1851_v15 = vsel %vm1819_vm9, %v1803_v63, %v1835_v4 }
 0x1ee   : > { %v3049_v16 = vpop.f32.mrf.mxu0  ;;  %3260 = vmatmul.mubr.msk.bf16.gmra.mxu0 %vm1899_vm1, %v1851_v15 }
 0x1ef   : > { %v1737_v18 = vadd.f32 %v3159_v13, %v1576_v12  ;;  %v3050_v19 = vadd.f32 %v3049_v16, %v3048_v10  ;;  %v3161_v20 = vpop.f32.mrf.mxu1 }
 0x1f0   : > { %v3051_v21 = vpop.f32.mrf.mxu0  ;;  %v3162_v28 = vadd.f32 %v3161_v20, %v3160_v14 }
 0x1f1   : > { %v1804_v22 = vpack.c.bf16 %v1737_v18, %v1734_v17  ;;  %v3163_v3 = vpop.f32.mrf.mxu1  ;;  %v1581_v24 = vadd.f32 %v3050_v19, %v3960_v37 }
 0x1f2   : > { %v3052_v23 = vpop.f32.mrf.mxu0 }
 0x1f3   : > { %v3053_v2 = vadd.f32 %v3052_v23, %v3051_v21  ;;  %v3164_v25 = vpop.f32.mrf.mxu1  ;;  %vm1820_vm10 = vcmp.gt.bf16.partialorder %v1804_v22, 0  ;;  %v1836_v26 = vmul.bf16 1036860877, %v1804_v22  ;;  %v1742_v32 = vadd.f32 %v3162_v28, %v1581_v24 }
 0x1f4   : > { %v3054_v27 = vpop.f32.mrf.mxu0  ;;  %v3165_v30 = vadd.f32 %v3164_v25, %v3163_v3 }
 0x1f5   : > { %v1584_v29 = vadd.f32 %v3053_v2, %v3960_v37  ;;  %v3166_v6 = vpop.f32.mrf.mxu1  ;;  %v1852_v7 = vsel %vm1820_vm10, %v1804_v22, %v1836_v26 }
 0x1f6   : > { %v3055_v31 = vpop.f32.mrf.mxu0  ;;  %3263 = vmatprep.mubr.msk.bf16.mxu0 %vm1899_vm1, %v1852_v7 }
 0x1f7   : > { %v1745_v33 = vadd.f32 %v3165_v30, %v1584_v29  ;;  %v3056_v34 = vadd.f32 %v3055_v31, %v3054_v27  ;;  %v3167_v35 = vpop.f32.mrf.mxu1 }
 0x1f8   : > { %v3057_v36 = vpop.f32.mrf.mxu0  ;;  %v3168_v46 = vadd.f32 %v3167_v35, %v3166_v6 }
 0x1f9   : > { %v1805_v38 = vpack.c.bf16 %v1745_v33, %v1742_v32  ;;  %v3169_v39 = vpop.f32.mrf.mxu1  ;;  %v1589_v42 = vadd.f32 %v3056_v34, %v3960_v37 }
 0x1fa   : > { %v3058_v40 = vpop.f32.mrf.mxu0 }
 0x1fb   : > { %v1837_v41 = vmul.bf16 1036860877, %v1805_v38  ;;  %v3059_v43 = vadd.f32 %v3058_v40, %v3057_v36  ;;  %v3170_v44 = vpop.f32.mrf.mxu1  ;;  %vm1821_vm11 = vcmp.gt.bf16.partialorder %v1805_v38, 0  ;;  %v1750_v52 = vadd.f32 %v3168_v46, %v1589_v42 }
 0x1fc   : > { %v3060_v45 = vpop.f32.mrf.mxu0  ;;  %v3171_v48 = vadd.f32 %v3170_v44, %v3169_v39 }
 0x1fd   : > { %v1592_v47 = vadd.f32 %v3059_v43, %v3960_v37  ;;  %v3172_v49 = vpop.f32.mrf.mxu1  ;;  %v1853_v50 = vsel %vm1821_vm11, %v1805_v38, %v1837_v41 }
 0x1fe   : > { %v3061_v51 = vpop.f32.mrf.mxu0  ;;  %3264 = vmatmul.mubr.msk.bf16.gmra.mxu0 %vm1899_vm1, %v1853_v50 }
 0x1ff   : > { %v1753_v53 = vadd.f32 %v3171_v48, %v1592_v47  ;;  %v3062_v54 = vadd.f32 %v3061_v51, %v3060_v45  ;;  %v3173_v55 = vpop.f32.mrf.mxu1 }
 0x200   : > { %v3063_v56 = vpop.f32.mrf.mxu0  ;;  %v3174_v1 = vadd.f32 %v3173_v55, %v3172_v49 }
 0x201   : > { %v1806_v57 = vpack.c.bf16 %v1753_v53, %v1750_v52  ;;  %v3175_v58 = vpop.f32.mrf.mxu1  ;;  %v1597_v60 = vadd.f32 %v3062_v54, %v3960_v37 }
 0x202   : > { %v3064_v59 = vpop.f32.mrf.mxu0 }
 0x203   : > { %v3065_v61 = vadd.f32 %v3064_v59, %v3063_v56  ;;  %v3176_v62 = vpop.f32.mrf.mxu1  ;;  %vm1822_vm12 = vcmp.gt.bf16.partialorder %v1806_v57, 0  ;;  %v1838_v63 = vmul.bf16 1036860877, %v1806_v57  ;;  %v1758_v11 = vadd.f32 %v3174_v1, %v1597_v60 }
 0x204   : > { %v3066_v0 = vpop.f32.mrf.mxu0  ;;  %v3177_v5 = vadd.f32 %v3176_v62, %v3175_v58 }
 0x205   : > { %v1600_v4 = vadd.f32 %v3065_v61, %v3960_v37  ;;  %v3178_v8 = vpop.f32.mrf.mxu1  ;;  %v1854_v9 = vsel %vm1822_vm12, %v1806_v57, %v1838_v63 }
 0x206   : > { %v3067_v10 = vpop.f32.mrf.mxu0  ;;  %3267 = vmatprep.mubr.msk.bf16.mxu0 %vm1899_vm1, %v1854_v9 }
 0x207   : > { %v1761_v12 = vadd.f32 %v3177_v5, %v1600_v4  ;;  %v3068_v13 = vadd.f32 %v3067_v10, %v3066_v0  ;;  %v3179_v14 = vpop.f32.mrf.mxu1 }
 0x208   : > { %v3069_v15 = vpop.f32.mrf.mxu0  ;;  %v3180_v23 = vadd.f32 %v3179_v14, %v3178_v8 }
 0x209   : > { %v1807_v16 = vpack.c.bf16 %v1761_v12, %v1758_v11  ;;  %v3181_v17 = vpop.f32.mrf.mxu1  ;;  %v1605_v20 = vadd.f32 %v3068_v13, %v3960_v37 }
 0x20a   : > { %v3070_v18 = vpop.f32.mrf.mxu0 }
 0x20b   : > { %v1839_v19 = vmul.bf16 1036860877, %v1807_v16  ;;  %v3071_v21 = vadd.f32 %v3070_v18, %v3069_v15  ;;  %v3182_v22 = vpop.f32.mrf.mxu1  ;;  %vm1823_vm13 = vcmp.gt.bf16.partialorder %v1807_v16, 0  ;;  %v1766_v28 = vadd.f32 %v3180_v23, %v1605_v20 }
 0x20c   : > { %v3072_v3 = vpop.f32.mrf.mxu0  ;;  %v3183_v2 = vadd.f32 %v3182_v22, %v3181_v17 }
 0x20d   : > { %v1608_v24 = vadd.f32 %v3071_v21, %v3960_v37  ;;  %v3184_v25 = vpop.f32.mrf.mxu1  ;;  %v1855_v26 = vsel %vm1823_vm13, %v1807_v16, %v1839_v19 }
 0x20e   : > { %v3073_v27 = vpop.f32.mrf.mxu0  ;;  %3268 = vmatmul.mubr.msk.bf16.gmra.mxu0 %vm1899_vm1, %v1855_v26 }
 0x20f   : > { %v1769_v29 = vadd.f32 %v3183_v2, %v1608_v24  ;;  %v3074_v30 = vadd.f32 %v3073_v27, %v3072_v3  ;;  %v3185_v6 = vpop.f32.mrf.mxu1 }
 0x210   : > { %v3075_v7 = vpop.f32.mrf.mxu0  ;;  %v3186_v40 = vadd.f32 %v3185_v6, %v3184_v25  ;;  %v4016_v25 = vld [vmem:[%s4502_s6] ss:$0 sm:$0xff] }
 0x211   : > { %v1808_v31 = vpack.c.bf16 %v1769_v29, %v1766_v28  ;;  %v3187_v32 = vpop.f32.mrf.mxu1  ;;  %v1613_v34 = vadd.f32 %v3074_v30, %v3960_v37 }
 0x212   : > { %v3076_v33 = vpop.f32.mrf.mxu0 }
 0x213   : > { %v3077_v35 = vadd.f32 %v3076_v33, %v3075_v7  ;;  %v3188_v36 = vpop.f32.mrf.mxu1  ;;  %vm1824_vm14 = vcmp.gt.bf16.partialorder %v1808_v31, 0  ;;  %v1840_v38 = vmul.bf16 1036860877, %v1808_v31  ;;  %v1774_v46 = vadd.f32 %v3186_v40, %v1613_v34 }
 0x214   : > { %v3078_v39 = vpop.f32.mrf.mxu0  ;;  %v3189_v42 = vadd.f32 %v3188_v36, %v3187_v32 }
 0x215   : > { %v1616_v41 = vadd.f32 %v3077_v35, %v3960_v37  ;;  %v3190_v43 = vpop.f32.mrf.mxu1  ;;  %v1856_v44 = vsel %vm1824_vm14, %v1808_v31, %v1840_v38 }
 0x216   : > { %v3079_v45 = vpop.f32.mrf.mxu0  ;;  %3271 = vmatprep.mubr.msk.bf16.mxu0 %vm1899_vm1, %v1856_v44 }
 0x217   : > { %v1777_v47 = vadd.f32 %v3189_v42, %v1616_v41  ;;  %v3080_v48 = vadd.f32 %v3079_v45, %v3078_v39  ;;  %v3191_v49 = vpop.f32.mrf.mxu1 }
 0x218   : > { %v3081_v50 = vpop.f32.mrf.mxu0  ;;  %v3192_v59 = vadd.f32 %v3191_v49, %v3190_v43 }
 0x219   : > { %v1809_v51 = vpack.c.bf16 %v1777_v47, %v1774_v46  ;;  %v3193_v52 = vpop.f32.mrf.mxu1  ;;  %v1621_v55 = vadd.f32 %v3080_v48, %v3960_v37 }
 0x21a   : > { %v3082_v53 = vpop.f32.mrf.mxu0 }
 0x21b   : > { %v1841_v54 = vmul.bf16 1036860877, %v1809_v51  ;;  %v3083_v56 = vadd.f32 %v3082_v53, %v3081_v50  ;;  %v3194_v57 = vpop.f32.mrf.mxu1  ;;  %vm1825_vm15 = vcmp.gt.bf16.partialorder %v1809_v51, 0  ;;  %v1782_v1 = vadd.f32 %v3192_v59, %v1621_v55 }
 0x21c   : > { %v3084_v58 = vpop.f32.mrf.mxu0  ;;  %v3195_v61 = vadd.f32 %v3194_v57, %v3193_v52 }
 0x21d   : > { %v1624_v60 = vadd.f32 %v3083_v56, %v3960_v37  ;;  %v3196_v62 = vpop.f32.mrf.mxu1  ;;  %v1857_v63 = vsel %vm1825_vm15, %v1809_v51, %v1841_v54 }
 0x21e   : > { %v3085_v0 = vpop.f32.mrf.mxu0  ;;  %3272 = vmatmul.mubr.msk.bf16.gmra.mxu0 %vm1899_vm1, %v1857_v63 }
 0x21f   : > { %v1785_v4 = vadd.f32 %v3195_v61, %v1624_v60  ;;  %v3086_v5 = vadd.f32 %v3085_v0, %v3084_v58  ;;  %v3197_v8 = vpop.f32.mrf.mxu1 }
 0x220   : > { %v3087_v9 = vpop.f32.mrf.mxu0  ;;  %v3198_v17 = vadd.f32 %v3197_v8, %v3196_v62 }
 0x221   : > { %v1810_v10 = vpack.c.bf16 %v1785_v4, %v1782_v1  ;;  %v3199_v11 = vpop.f32.mrf.mxu1  ;;  %v1629_v13 = vadd.f32 %v3086_v5, %v3960_v37 }
 0x222   : > { %v3088_v12 = vpop.f32.mrf.mxu0 }
 0x223   : > { %v3089_v14 = vadd.f32 %v3088_v12, %v3087_v9  ;;  %v3200_v15 = vpop.f32.mrf.mxu1  ;;  %vm1826_vm0 = vcmp.gt.bf16.partialorder %v1810_v10, 0  ;;  %v1842_v16 = vmul.bf16 1036860877, %v1810_v10  ;;  %v1790_v21 = vadd.f32 %v3198_v17, %v1629_v13 }
 0x224   : > { %v3201_v19 = vadd.f32 %v3200_v15, %v3199_v11 }
 0x225   : > { %v1632_v18 = vadd.f32 %v3089_v14, %v3960_v37  ;;  %v1858_v20 = vsel %vm1826_vm0, %v1810_v10, %v1842_v16 }
 0x226   : > { %3275 = vmatprep.mubr.msk.bf16.mxu0 %vm1899_vm1, %v1858_v20 }
 0x227   : > { %v1793_v22 = vadd.f32 %v3201_v19, %v1632_v18 }
 0x229   : > { %v1811_v3 = vpack.c.bf16 %v1793_v22, %v1790_v21 }
 0x22b   : > { %v1843_v23 = vmul.bf16 1036860877, %v1811_v3  ;;  %vm1827_vm2 = vcmp.gt.bf16.partialorder %v1811_v3, 0 }
 0x22d   : > { %v1859_v24 = vsel %vm1827_vm2, %v1811_v3, %v1843_v23 }
 0x22e   : > { %3276 = vmatmul.mubr.msk.bf16.gmra.mxu0 %vm1899_vm1, %v1859_v24 }
 0x27e   : > { %v3249_v2 = vpop.f32.mrf.mxu0 }
 0x27f   : > { %v1991_v27 = vadd.f32 %v3249_v2, %v4016_v25 }
 0x280   : > { %v1982_v26 = vpop.f32.mrf.mxu0 }
 0x281   : > { %v1983_v30 = vadd.f32 %v4016_v25, %v1982_v26 }
 0x282   : > { %v3250_v37 = vpop.f32.mrf.mxu0 }
 0x283   : > { %v1994_v28 = vadd.f32 %v3250_v37, %v4016_v25 }
 0x284   : > { %v1985_v29 = vpop.f32.mrf.mxu0 }
 0x285   : > { %v2110_v6 = vpack.c.bf16 %v1994_v28, %v1991_v27  ;;  %v1986_v7 = vadd.f32 %v4016_v25, %v1985_v29 }
 0x287   : > { %v2109_v31 = vpack.c.bf16 %v1986_v7, %v1983_v30  ;;  %v2142_v32 = vmul.bf16 1036860877, %v2110_v6  ;;  %vm2126_vm1 = vcmp.gt.bf16.partialorder %v2110_v6, 0 }
 0x289   : > { %v2141_v33 = vmul.bf16 1036860877, %v2109_v31  ;;  %vm2125_vm3 = vcmp.gt.bf16.partialorder %v2109_v31, 0  ;;  %v2158_v35 = vsel %vm2126_vm1, %v2110_v6, %v2142_v32 }
 0x28b   : > { %v2157_v34 = vsel %vm2125_vm3, %v2109_v31, %v2141_v33  ;;  %vm2398_vm3 = vcmask 31744  }
 0x28c   : > { %3281 = vmatprep.mubr.msk.bf16.mxu1 %vm2188_vm4, %v2157_v34 }
 0x28d   : > { %3282 = vmatmul.mubr.msk.bf16.vlgmr.msra.gmra.mxu1 %vm2188_vm4, %v2158_v35 }
 0x28e   : > { %v3253_v36 = vpop.f32.mrf.mxu0 }
 0x28f   : > { %v2007_v40 = vadd.f32 %v3253_v36, %v4016_v25 }
 0x290   : > { %v1998_v38 = vpop.f32.mrf.mxu0 }
 0x291   : > { %v1999_v43 = vadd.f32 %v4016_v25, %v1998_v38 }
 0x292   : > { %v3254_v39 = vpop.f32.mrf.mxu0 }
 0x293   : > { %v2010_v41 = vadd.f32 %v3254_v39, %v4016_v25 }
 0x294   : > { %v2001_v42 = vpop.f32.mrf.mxu0 }
 0x295   : > { %v2112_v44 = vpack.c.bf16 %v2010_v41, %v2007_v40  ;;  %v2002_v45 = vadd.f32 %v4016_v25, %v2001_v42 }
 0x297   : > { %v2111_v46 = vpack.c.bf16 %v2002_v45, %v1999_v43  ;;  %v2144_v47 = vmul.bf16 1036860877, %v2112_v44  ;;  %vm2128_vm5 = vcmp.gt.bf16.partialorder %v2112_v44, 0 }
 0x299   : > { %v2143_v48 = vmul.bf16 1036860877, %v2111_v46  ;;  %vm2127_vm6 = vcmp.gt.bf16.partialorder %v2111_v46, 0  ;;  %v2160_v50 = vsel %vm2128_vm5, %v2112_v44, %v2144_v47 }
 0x29b   : > { %v2159_v49 = vsel %vm2127_vm6, %v2111_v46, %v2143_v48 }
 0x29c   : > { %3285 = vmatprep.mubr.msk.bf16.mxu1 %vm2188_vm4, %v2159_v49 }
 0x29d   : > { %3286 = vmatmul.mubr.msk.bf16.gmra.mxu1 %vm2188_vm4, %v2160_v50 }
 0x29e   : > { %v3257_v51 = vpop.f32.mrf.mxu0 }
 0x29f   : > { %v2023_v54 = vadd.f32 %v3257_v51, %v4016_v25 }
 0x2a0   : > { %v2014_v52 = vpop.f32.mrf.mxu0 }
 0x2a1   : > { %v2015_v57 = vadd.f32 %v4016_v25, %v2014_v52 }
 0x2a2   : > { %v3258_v53 = vpop.f32.mrf.mxu0 }
 0x2a3   : > { %v2026_v55 = vadd.f32 %v3258_v53, %v4016_v25 }
 0x2a4   : > { %v2017_v56 = vpop.f32.mrf.mxu0 }
 0x2a5   : > { %v2114_v58 = vpack.c.bf16 %v2026_v55, %v2023_v54  ;;  %v2018_v59 = vadd.f32 %v4016_v25, %v2017_v56 }
 0x2a7   : > { %v2113_v60 = vpack.c.bf16 %v2018_v59, %v2015_v57  ;;  %v2146_v61 = vmul.bf16 1036860877, %v2114_v58  ;;  %vm2130_vm7 = vcmp.gt.bf16.partialorder %v2114_v58, 0 }
 0x2a9   : > { %v2145_v62 = vmul.bf16 1036860877, %v2113_v60  ;;  %vm2129_vm8 = vcmp.gt.bf16.partialorder %v2113_v60, 0  ;;  %v2162_v0 = vsel %vm2130_vm7, %v2114_v58, %v2146_v61 }
 0x2ab   : > { %v2161_v63 = vsel %vm2129_vm8, %v2113_v60, %v2145_v62 }
 0x2ac   : > { %3289 = vmatprep.mubr.msk.bf16.mxu1 %vm2188_vm4, %v2161_v63 }
 0x2ad   : > { %3290 = vmatmul.mubr.msk.bf16.gmra.mxu1 %vm2188_vm4, %v2162_v0 }
 0x2ae   : > { %v3261_v1 = vpop.f32.mrf.mxu0 }
 0x2af   : > { %v2039_v8 = vadd.f32 %v3261_v1, %v4016_v25 }
 0x2b0   : > { %v2030_v4 = vpop.f32.mrf.mxu0 }
 0x2b1   : > { %v2031_v11 = vadd.f32 %v4016_v25, %v2030_v4 }
 0x2b2   : > { %v3262_v5 = vpop.f32.mrf.mxu0 }
 0x2b3   : > { %v2042_v9 = vadd.f32 %v3262_v5, %v4016_v25 }
 0x2b4   : > { %v2033_v10 = vpop.f32.mrf.mxu0 }
 0x2b5   : > { %v2116_v12 = vpack.c.bf16 %v2042_v9, %v2039_v8  ;;  %v2034_v13 = vadd.f32 %v4016_v25, %v2033_v10 }
 0x2b7   : > { %v2115_v14 = vpack.c.bf16 %v2034_v13, %v2031_v11  ;;  %v2148_v15 = vmul.bf16 1036860877, %v2116_v12  ;;  %vm2132_vm9 = vcmp.gt.bf16.partialorder %v2116_v12, 0 }
 0x2b9   : > { %v2147_v16 = vmul.bf16 1036860877, %v2115_v14  ;;  %vm2131_vm10 = vcmp.gt.bf16.partialorder %v2115_v14, 0  ;;  %v2164_v18 = vsel %vm2132_vm9, %v2116_v12, %v2148_v15  ;;  %v4069_v12 = vld [vmem:[%s4504_s8] ss:$0 sm:$0xff] }
 0x2bb   : > { %v2163_v17 = vsel %vm2131_vm10, %v2115_v14, %v2147_v16 }
 0x2bc   : > { %3293 = vmatprep.mubr.msk.bf16.mxu1 %vm2188_vm4, %v2163_v17 }
 0x2bd   : > { %3294 = vmatmul.mubr.msk.bf16.gmra.mxu1 %vm2188_vm4, %v2164_v18 }
 0x2be   : > { %v3265_v19 = vpop.f32.mrf.mxu0 }
 0x2bf   : > { %v2055_v22 = vadd.f32 %v3265_v19, %v4016_v25 }
 0x2c0   : > { %v2046_v20 = vpop.f32.mrf.mxu0 }
 0x2c1   : > { %v2047_v24 = vadd.f32 %v4016_v25, %v2046_v20 }
 0x2c2   : > { %v3266_v21 = vpop.f32.mrf.mxu0 }
 0x2c3   : > { %v2058_v3 = vadd.f32 %v3266_v21, %v4016_v25 }
 0x2c4   : > { %v2049_v23 = vpop.f32.mrf.mxu0 }
 0x2c5   : > { %v2118_v2 = vpack.c.bf16 %v2058_v3, %v2055_v22  ;;  %v2050_v26 = vadd.f32 %v4016_v25, %v2049_v23 }
 0x2c7   : > { %v2117_v37 = vpack.c.bf16 %v2050_v26, %v2047_v24  ;;  %v2150_v27 = vmul.bf16 1036860877, %v2118_v2  ;;  %vm2134_vm11 = vcmp.gt.bf16.partialorder %v2118_v2, 0 }
 0x2c9   : > { %v2149_v28 = vmul.bf16 1036860877, %v2117_v37  ;;  %vm2133_vm12 = vcmp.gt.bf16.partialorder %v2117_v37, 0  ;;  %v2166_v30 = vsel %vm2134_vm11, %v2118_v2, %v2150_v27 }
 0x2cb   : > { %v2165_v29 = vsel %vm2133_vm12, %v2117_v37, %v2149_v28 }
 0x2cc   : > { %3297 = vmatprep.mubr.msk.bf16.mxu1 %vm2188_vm4, %v2165_v29 }
 0x2cd   : > { %3298 = vmatmul.mubr.msk.bf16.gmra.mxu1 %vm2188_vm4, %v2166_v30 }
 0x2ce   : > { %v3269_v6 = vpop.f32.mrf.mxu0 }
 0x2cf   : > { %v2071_v32 = vadd.f32 %v3269_v6, %v4016_v25 }
 0x2d0   : > { %v2062_v7 = vpop.f32.mrf.mxu0 }
 0x2d1   : > { %v2063_v35 = vadd.f32 %v4016_v25, %v2062_v7 }
 0x2d2   : > { %v3270_v31 = vpop.f32.mrf.mxu0 }
 0x2d3   : > { %v2074_v33 = vadd.f32 %v3270_v31, %v4016_v25 }
 0x2d4   : > { %v2065_v34 = vpop.f32.mrf.mxu0 }
 0x2d5   : > { %v2120_v36 = vpack.c.bf16 %v2074_v33, %v2071_v32  ;;  %v2066_v38 = vadd.f32 %v4016_v25, %v2065_v34 }
 0x2d7   : > { %v2119_v39 = vpack.c.bf16 %v2066_v38, %v2063_v35  ;;  %v2152_v40 = vmul.bf16 1036860877, %v2120_v36  ;;  %vm2136_vm13 = vcmp.gt.bf16.partialorder %v2120_v36, 0 }
 0x2d9   : > { %v2151_v41 = vmul.bf16 1036860877, %v2119_v39  ;;  %vm2135_vm14 = vcmp.gt.bf16.partialorder %v2119_v39, 0  ;;  %v2168_v43 = vsel %vm2136_vm13, %v2120_v36, %v2152_v40 }
 0x2db   : > { %v2167_v42 = vsel %vm2135_vm14, %v2119_v39, %v2151_v41 }
 0x2dc   : > { %3301 = vmatprep.mubr.msk.bf16.mxu1 %vm2188_vm4, %v2167_v42 }
 0x2dd   : > { %3302 = vmatmul.mubr.msk.bf16.gmra.mxu1 %vm2188_vm4, %v2168_v43 }
 0x2de   : > { %v3273_v44 = vpop.f32.mrf.mxu0 }
 0x2df   : > { %v2087_v47 = vadd.f32 %v3273_v44, %v4016_v25 }
 0x2e0   : > { %v2078_v45 = vpop.f32.mrf.mxu0 }
 0x2e1   : > { %v2079_v50 = vadd.f32 %v4016_v25, %v2078_v45 }
 0x2e2   : > { %v3274_v46 = vpop.f32.mrf.mxu0 }
 0x2e3   : > { %v2090_v48 = vadd.f32 %v3274_v46, %v4016_v25 }
 0x2e4   : > { %v2081_v49 = vpop.f32.mrf.mxu0 }
 0x2e5   : > { %v2122_v51 = vpack.c.bf16 %v2090_v48, %v2087_v47  ;;  %v2082_v52 = vadd.f32 %v4016_v25, %v2081_v49 }
 0x2e7   : > { %v2121_v53 = vpack.c.bf16 %v2082_v52, %v2079_v50  ;;  %v2154_v54 = vmul.bf16 1036860877, %v2122_v51  ;;  %vm2138_vm15 = vcmp.gt.bf16.partialorder %v2122_v51, 0 }
 0x2e9   : > { %v2153_v55 = vmul.bf16 1036860877, %v2121_v53  ;;  %vm2137_vm0 = vcmp.gt.bf16.partialorder %v2121_v53, 0  ;;  %v2170_v57 = vsel %vm2138_vm15, %v2122_v51, %v2154_v54 }
 0x2eb   : > { %v2169_v56 = vsel %vm2137_vm0, %v2121_v53, %v2153_v55 }
 0x2ec   : > { %3305 = vmatprep.mubr.msk.bf16.mxu1 %vm2188_vm4, %v2169_v56 }
 0x2ed   : > { %3306 = vmatmul.mubr.msk.bf16.gmra.mxu1 %vm2188_vm4, %v2170_v57 }
 0x2ee   : > { %v3277_v58 = vpop.f32.mrf.mxu0 }
 0x2ef   : > { %v2103_v61 = vadd.f32 %v3277_v58, %v4016_v25 }
 0x2f0   : > { %v2094_v59 = vpop.f32.mrf.mxu0 }
 0x2f1   : > { %v2095_v0 = vadd.f32 %v4016_v25, %v2094_v59 }
 0x2f2   : > { %v3278_v60 = vpop.f32.mrf.mxu0 }
 0x2f3   : > { %v2106_v62 = vadd.f32 %v3278_v60, %v4016_v25 }
 0x2f4   : > { %v2097_v63 = vpop.f32.mrf.mxu0 }
 0x2f5   : > { %v2124_v1 = vpack.c.bf16 %v2106_v62, %v2103_v61  ;;  %v2098_v4 = vadd.f32 %v4016_v25, %v2097_v63 }
 0x2f7   : > { %v2123_v5 = vpack.c.bf16 %v2098_v4, %v2095_v0  ;;  %v2156_v8 = vmul.bf16 1036860877, %v2124_v1  ;;  %vm2140_vm2 = vcmp.gt.bf16.partialorder %v2124_v1, 0 }
 0x2f9   : > { %v2155_v9 = vmul.bf16 1036860877, %v2123_v5  ;;  %vm2139_vm1 = vcmp.gt.bf16.partialorder %v2123_v5, 0  ;;  %v2172_v11 = vsel %vm2140_vm2, %v2124_v1, %v2156_v8 }
 0x2fb   : > { %v2171_v10 = vsel %vm2139_vm1, %v2123_v5, %v2155_v9 }
 0x2fc   : > { %3309 = vmatprep.mubr.msk.bf16.mxu1 %vm2188_vm4, %v2171_v10 }
 0x2fd   : > { %3310 = vmatmul.mubr.msk.bf16.gmra.mxu1 %vm2188_vm4, %v2172_v11 }
 0x34d   : > { %v3283_v13 = vpop.f32.mrf.mxu1 }
 0x34e   : > { %v4072_v25 = vadd.f32 %v3283_v13, %v4069_v12 }
 0x34f   : > { %v2271_v14 = vpop.f32.mrf.mxu1 }
 0x350   : > { %v4075_v15 = vadd.f32 %v4069_v12, %v2271_v14  ;;  %v2405_v16 = vsel %vm2398_vm3, %v4072_v25, -inf }
 0x351   : > { %2406 = vmax.xlane.f32.xlu1 %v2405_v16  ;;  %v3284_v17 = vpop.f32.mrf.mxu1 }
 0x352   : > { %v4080_v18 = vadd.f32 %v3284_v17, %v4069_v12  ;;  %v2399_v19 = vsel %vm2398_vm3, %v4075_v15, -inf }
 0x353   : > { %v2274_v20 = vpop.f32.mrf.mxu1  ;;  %2400 = vmax.xlane.f32.xlu0 %v2399_v19 }
 0x354   : > { %v4085_v21 = vadd.f32 %v4069_v12, %v2274_v20  ;;  %v2408_v22 = vsel %vm2398_vm3, %v4080_v18, -inf }
 0x355   : > { %2409 = vmax.xlane.f32.xlu1 %v2408_v22 }
 0x356   : > { %v2402_v3 = vsel %vm2398_vm3, %v4085_v21, -inf }
 0x357   : > { %2403 = vmax.xlane.f32.xlu0 %v2402_v3 }
 0x35d   : > { %v3287_v23 = vpop.f32.mrf.mxu1 }
 0x35e   : > { %v4092_v24 = vadd.f32 %v3287_v23, %v4069_v12 }
 0x35f   : > { %v2287_v2 = vpop.f32.mrf.mxu1 }
 0x360   : > { %v4095_v26 = vadd.f32 %v4069_v12, %v2287_v2  ;;  %v2417_v37 = vsel %vm2398_vm3, %v4092_v24, -inf }
 0x361   : > { %v3288_v27 = vpop.f32.mrf.mxu1  ;;  %2418 = vmax.xlane.f32.xlu0 %v2417_v37 }
 0x362   : > { %v4100_v28 = vadd.f32 %v3288_v27, %v4069_v12  ;;  %v2411_v7 = vsel %vm2398_vm3, %v4095_v26, -inf }
 0x363   : > { %v2290_v29 = vpop.f32.mrf.mxu1 }
 0x364   : > { %v4103_v30 = vadd.f32 %v4069_v12, %v2290_v29  ;;  %v2420_v6 = vsel %vm2398_vm3, %v4100_v28, -inf }
 0x365   : > { %2421 = vmax.xlane.f32.xlu1 %v2420_v6  ;;  %2412 = vmax.xlane.f32.xlu0 %v2411_v7 }
 0x366   : > { %v2414_v31 = vsel %vm2398_vm3, %v4103_v30, -inf }
 0x369   : > { %2415 = vmax.xlane.f32.xlu1 %v2414_v31 }
 0x36d   : > { %v3291_v32 = vpop.f32.mrf.mxu1 }
 0x36e   : > { %v4112_v33 = vadd.f32 %v3291_v32, %v4069_v12 }
 0x36f   : > { %v2303_v34 = vpop.f32.mrf.mxu1 }
 0x370   : > { %v4115_v35 = vadd.f32 %v4069_v12, %v2303_v34  ;;  %v2429_v36 = vsel %vm2398_vm3, %v4112_v33, -inf }
 0x371   : > { %v3292_v38 = vpop.f32.mrf.mxu1  ;;  %2430 = vmax.xlane.f32.xlu0 %v2429_v36 }
 0x372   : > { %v4120_v39 = vadd.f32 %v3292_v38, %v4069_v12  ;;  %v2423_v43 = vsel %vm2398_vm3, %v4115_v35, -inf }
 0x373   : > { %v2306_v40 = vpop.f32.mrf.mxu1 }
 0x374   : > { %v4123_v41 = vadd.f32 %v4069_v12, %v2306_v40  ;;  %v2432_v42 = vsel %vm2398_vm3, %v4120_v39, -inf }
 0x375   : > { %2433 = vmax.xlane.f32.xlu1 %v2432_v42  ;;  %2424 = vmax.xlane.f32.xlu0 %v2423_v43 }
 0x376   : > { %v2426_v44 = vsel %vm2398_vm3, %v4123_v41, -inf }
 0x379   : > { %2427 = vmax.xlane.f32.xlu1 %v2426_v44 }
 0x37d   : > { %v3295_v45 = vpop.f32.mrf.mxu1 }
 0x37e   : > { %v4132_v46 = vadd.f32 %v3295_v45, %v4069_v12 }
 0x37f   : > { %v2319_v47 = vpop.f32.mrf.mxu1 }
 0x380   : > { %v4135_v48 = vadd.f32 %v4069_v12, %v2319_v47  ;;  %v2441_v49 = vsel %vm2398_vm3, %v4132_v46, -inf }
 0x381   : > { %v3296_v50 = vpop.f32.mrf.mxu1  ;;  %2442 = vmax.xlane.f32.xlu0 %v2441_v49 }
 0x382   : > { %v4140_v51 = vadd.f32 %v3296_v50, %v4069_v12  ;;  %v2435_v55 = vsel %vm2398_vm3, %v4135_v48, -inf }
 0x383   : > { %v2322_v52 = vpop.f32.mrf.mxu1 }
 0x384   : > { %v4143_v53 = vadd.f32 %v4069_v12, %v2322_v52  ;;  %v2444_v54 = vsel %vm2398_vm3, %v4140_v51, -inf }
 0x385   : > { %2445 = vmax.xlane.f32.xlu1 %v2444_v54  ;;  %2436 = vmax.xlane.f32.xlu0 %v2435_v55 }
 0x386   : > { %v2438_v56 = vsel %vm2398_vm3, %v4143_v53, -inf }
 0x389   : > { %2439 = vmax.xlane.f32.xlu1 %v2438_v56 }
 0x38d   : > { %v3299_v57 = vpop.f32.mrf.mxu1 }
 0x38e   : > { %v4152_v58 = vadd.f32 %v3299_v57, %v4069_v12 }
 0x38f   : > { %v2335_v59 = vpop.f32.mrf.mxu1 }
 0x390   : > { %v4155_v60 = vadd.f32 %v4069_v12, %v2335_v59  ;;  %v2453_v61 = vsel %vm2398_vm3, %v4152_v58, -inf }
 0x391   : > { %v3300_v62 = vpop.f32.mrf.mxu1  ;;  %2454 = vmax.xlane.f32.xlu0 %v2453_v61 }
 0x392   : > { %v4160_v63 = vadd.f32 %v3300_v62, %v4069_v12  ;;  %v2447_v5 = vsel %vm2398_vm3, %v4155_v60, -inf }
 0x393   : > { %v2338_v0 = vpop.f32.mrf.mxu1 }
 0x394   : > { %v4163_v1 = vadd.f32 %v4069_v12, %v2338_v0  ;;  %v2456_v4 = vsel %vm2398_vm3, %v4160_v63, -inf }
 0x395   : > { %2457 = vmax.xlane.f32.xlu1 %v2456_v4  ;;  %2448 = vmax.xlane.f32.xlu0 %v2447_v5 }
 0x396   : > { %v2450_v8 = vsel %vm2398_vm3, %v4163_v1, -inf }
 0x399   : > { %2451 = vmax.xlane.f32.xlu1 %v2450_v8 }
 0x39d   : > { %v3303_v9 = vpop.f32.mrf.mxu1 }
 0x39e   : > { %v4172_v10 = vadd.f32 %v3303_v9, %v4069_v12 }
 0x39f   : > { %v2351_v11 = vpop.f32.mrf.mxu1 }
 0x3a0   : > { %v4175_v13 = vadd.f32 %v4069_v12, %v2351_v11  ;;  %v2465_v14 = vsel %vm2398_vm3, %v4172_v10, -inf }
 0x3a1   : > { %v3304_v16 = vpop.f32.mrf.mxu1  ;;  %2466 = vmax.xlane.f32.xlu0 %v2465_v14 }
 0x3a2   : > { %v4180_v17 = vadd.f32 %v3304_v16, %v4069_v12  ;;  %v2459_v3 = vsel %vm2398_vm3, %v4175_v13, -inf }
 0x3a3   : > { %v2354_v19 = vpop.f32.mrf.mxu1 }
 0x3a4   : > { %v4183_v20 = vadd.f32 %v4069_v12, %v2354_v19  ;;  %v2468_v22 = vsel %vm2398_vm3, %v4180_v17, -inf }
 0x3a5   : > { %2469 = vmax.xlane.f32.xlu1 %v2468_v22  ;;  %2460 = vmax.xlane.f32.xlu0 %v2459_v3 }
 0x3a6   : > { %v2462_v23 = vsel %vm2398_vm3, %v4183_v20, -inf }
 0x3a9   : > { %2463 = vmax.xlane.f32.xlu1 %v2462_v23 }
 0x3ad   : > { %v3307_v2 = vpop.f32.mrf.mxu1 }
 0x3ae   : > { %v4192_v37 = vadd.f32 %v3307_v2, %v4069_v12 }
 0x3af   : > { %v2367_v27 = vpop.f32.mrf.mxu1 }
 0x3b0   : > { %v4195_v29 = vadd.f32 %v4069_v12, %v2367_v27  ;;  %v2477_v6 = vsel %vm2398_vm3, %v4192_v37, -inf }
 0x3b1   : > { %v3308_v7 = vpop.f32.mrf.mxu1  ;;  %2478 = vmax.xlane.f32.xlu0 %v2477_v6 }
 0x3b2   : > { %v4200_v31 = vadd.f32 %v3308_v7, %v4069_v12  ;;  %v2471_v38 = vsel %vm2398_vm3, %v4195_v29, -inf }
 0x3b3   : > { %v2370_v32 = vpop.f32.mrf.mxu1 }
 0x3b4   : > { %v4203_v34 = vadd.f32 %v4069_v12, %v2370_v32  ;;  %v2480_v36 = vsel %vm2398_vm3, %v4200_v31, -inf }
 0x3b5   : > { %2481 = vmax.xlane.f32.xlu1 %v2480_v36  ;;  %2472 = vmax.xlane.f32.xlu0 %v2471_v38 }
 0x3b6   : > { %v2474_v40 = vsel %vm2398_vm3, %v4203_v34, -inf }
 0x3b9   : > { %2475 = vmax.xlane.f32.xlu1 %v2474_v40 }
 0x3bd   : > { %v3311_v42 = vpop.f32.mrf.mxu1 }
 0x3be   : > { %v4215_v47 = vadd.f32 %v3311_v42, %v4069_v12 }
 0x3bf   : > { %v2383_v43 = vpop.f32.mrf.mxu1 }
 0x3c0   : > { %v4212_v44 = vadd.f32 %v4069_v12, %v2383_v43  ;;  %v2489_v56 = vsel %vm2398_vm3, %v4215_v47, -inf }
 0x3c1   : > { %v3312_v45 = vpop.f32.mrf.mxu1 }
 0x3c2   : > { %v2483_v49 = vsel %vm2398_vm3, %v4212_v44, -inf  ;;  %v4223_v54 = vadd.f32 %v3312_v45, %v4069_v12 }
 0x3c3   : > { %v2386_v50 = vpop.f32.mrf.mxu1  ;;  %2484 = vmax.xlane.f32.xlu0 %v2483_v49 }
 0x3c4   : > { %v4220_v52 = vadd.f32 %v4069_v12, %v2386_v50  ;;  %v2492_v57 = vsel %vm2398_vm3, %v4223_v54, -inf }
 0x3c6   : > { %v2486_v55 = vsel %vm2398_vm3, %v4220_v52, -inf }
 0x3c7   : > { %2487 = vmax.xlane.f32.xlu1 %v2486_v55  ;;  %2490 = vmax.xlane.f32.xlu0 %v2489_v56 }
 0x3cb   : > { %2493 = vmax.xlane.f32.xlu1 %v2492_v57 }
 0x3da   : > { %v2407_v59 = vpop.xlane.xlu1 %2406 }
 0x3db   : > { %v2497_v61 = vsub.f32 %v4072_v25, %v2407_v59 }
 0x3dc   : > { %v2401_v62 = vpop.xlane.xlu0 %2400 }
 0x3dd   : > { %v2531_v0 = vmul.f32 1.442695, %v2497_v61  ;;  %v2495_v12 = vsub.f32 %v4075_v15, %v2401_v62 }
 0x3de   : > { %v2410_v4 = vpop.xlane.xlu1 %2409 }
 0x3df   : > { %3387 = vpow2.f32 %v2531_v0  ;;  %v2527_v5 = vmul.f32 1.442695, %v2495_v12  ;;  %v2498_v8 = vsub.f32 %v4080_v18, %v2410_v4 }
 0x3e0   : > { %v2404_v9 = vpop.xlane.xlu0 %2403 }
 0x3e1   : > { %3389 = vpow2.f32 %v2527_v5  ;;  %v2533_v11 = vmul.f32 1.442695, %v2498_v8  ;;  %v2496_v14 = vsub.f32 %v4085_v21, %v2404_v9 }
 0x3e3   : > { %3391 = vpow2.f32 %v2533_v11  ;;  %v2529_v16 = vmul.f32 1.442695, %v2496_v14 }
 0x3e5   : > { %3393 = vpow2.f32 %v2529_v16 }
 0x3ea   : > { %v2419_v19 = vpop.xlane.xlu0 %2418 }
 0x3eb   : > { %v2501_v25 = vsub.f32 %v4092_v24, %v2419_v19 }
 0x3ec   : > { %v4236_v22 = vpop.eup %3387 }
 0x3ed   : > { %v2539_v3 = vmul.f32 1.442695, %v2501_v25  ;;  %v2597_v15 = vsel %vm2398_vm3, %v4236_v22, 0.0 }
 0x3ee   : > { %v4240_v23 = vpop.eup %3389  ;;  %v2422_v18 = vpop.xlane.xlu1 %2421  ;;  %2598 = vadd.xlane.f32.xlu0 %v2597_v15 }
 0x3ef   : > { %v2413_v2 = vpop.xlane.xlu0 %2412  ;;  %3395 = vpow2.f32 %v2539_v3  ;;  %v2502_v21 = vsub.f32 %v4100_v28, %v2422_v18  ;;  %v2591_v36 = vsel %vm2398_vm3, %v4240_v23, 0.0 }
 0x3f0   : > { %v2499_v27 = vsub.f32 %v4095_v26, %v2413_v2  ;;  %v4244_v6 = vpop.eup %3391 }
 0x3f1   : > { %v2541_v7 = vmul.f32 1.442695, %v2502_v21  ;;  %v2600_v32 = vsel %vm2398_vm3, %v4244_v6, 0.0 }
 0x3f2   : > { %v2535_v24 = vmul.f32 1.442695, %v2499_v27  ;;  %v4250_v38 = vpop.eup %3393  ;;  %2601 = vadd.xlane.f32.xlu1 %v2600_v32  ;;  %v2416_v40 = vpop.xlane.xlu1 %2415  ;;  %2592 = vadd.xlane.f32.xlu0 %v2591_v36 }
 0x3f3   : > { %3397 = vpow2.f32 %v2541_v7  ;;  %v2500_v28 = vsub.f32 %v4103_v30, %v2416_v40  ;;  %v2594_v42 = vsel %vm2398_vm3, %v4250_v38, 0.0 }
 0x3f4   : > { %3399 = vpow2.f32 %v2535_v24 }
 0x3f5   : > { %v2537_v26 = vmul.f32 1.442695, %v2500_v28 }
 0x3f6   : > { %2595 = vadd.xlane.f32.xlu1 %v2594_v42 }
 0x3f7   : > { %3401 = vpow2.f32 %v2537_v26 }
 0x3fa   : > { %v2431_v43 = vpop.xlane.xlu0 %2430 }
 0x3fb   : > { %v2505_v45 = vsub.f32 %v4112_v33, %v2431_v43 }
 0x3fc   : > { %v4256_v49 = vpop.eup %3395 }
 0x3fd   : > { %v2547_v50 = vmul.f32 1.442695, %v2505_v45  ;;  %v2609_v55 = vsel %vm2398_vm3, %v4256_v49, 0.0 }
 0x3fe   : > { %v2434_v56 = vpop.xlane.xlu1 %2433  ;;  %2610 = vadd.xlane.f32.xlu0 %v2609_v55  ;;  %v2425_v57 = vpop.xlane.xlu0 %2424 }
 0x3ff   : > { %3403 = vpow2.f32 %v2547_v50  ;;  %v2506_v30 = vsub.f32 %v4120_v39, %v2434_v56  ;;  %v2503_v59 = vsub.f32 %v4115_v35, %v2425_v57 }
 0x400   : > { %v4262_v61 = vpop.eup %3397 }
 0x401   : > { %v4264_v62 = vpop.eup %3399  ;;  %v2549_v0 = vmul.f32 1.442695, %v2506_v30  ;;  %v2543_v33 = vmul.f32 1.442695, %v2503_v59  ;;  %v2612_v12 = vsel %vm2398_vm3, %v4262_v61, 0.0 }
 0x402   : > { %v2428_v4 = vpop.xlane.xlu1 %2427  ;;  %2613 = vadd.xlane.f32.xlu1 %v2612_v12  ;;  %v2603_v5 = vsel %vm2398_vm3, %v4264_v62, 0.0 }
 0x403   : > { %3405 = vpow2.f32 %v2549_v0  ;;  %v2504_v8 = vsub.f32 %v4123_v41, %v2428_v4  ;;  %2604 = vadd.xlane.f32.xlu0 %v2603_v5 }
 0x404   : > { %v4271_v39 = vpop.eup %3401  ;;  %3407 = vpow2.f32 %v2543_v33 }
 0x405   : > { %v2545_v35 = vmul.f32 1.442695, %v2504_v8  ;;  %v2606_v9 = vsel %vm2398_vm3, %v4271_v39, 0.0 }
 0x406   : > { %2607 = vadd.xlane.f32.xlu1 %v2606_v9 }
 0x407   : > { %3409 = vpow2.f32 %v2545_v35 }
 0x40a   : > { %v2443_v11 = vpop.xlane.xlu0 %2442 }
 0x40b   : > { %v2509_v14 = vsub.f32 %v4132_v46, %v2443_v11 }
 0x40c   : > { %v4276_v16 = vpop.eup %3403 }
 0x40d   : > { %v2555_v19 = vmul.f32 1.442695, %v2509_v14  ;;  %v2621_v25 = vsel %vm2398_vm3, %v4276_v16, 0.0 }
 0x40e   : > { %v2446_v41 = vpop.xlane.xlu1 %2445  ;;  %2622 = vadd.xlane.f32.xlu0 %v2621_v25  ;;  %v2437_v3 = vpop.xlane.xlu0 %2436 }
 0x40f   : > { %3411 = vpow2.f32 %v2555_v19  ;;  %v2510_v15 = vsub.f32 %v4140_v51, %v2446_v41  ;;  %v2507_v18 = vsub.f32 %v4135_v48, %v2437_v3 }
 0x410   : > { %v4282_v2 = vpop.eup %3405 }
 0x411   : > { %v4284_v21 = vpop.eup %3407  ;;  %v2557_v27 = vmul.f32 1.442695, %v2510_v15  ;;  %v2551_v46 = vmul.f32 1.442695, %v2507_v18  ;;  %v2624_v7 = vsel %vm2398_vm3, %v4282_v2, 0.0 }
 0x412   : > { %v2440_v24 = vpop.xlane.xlu1 %2439  ;;  %2625 = vadd.xlane.f32.xlu1 %v2624_v7  ;;  %v2615_v32 = vsel %vm2398_vm3, %v4284_v21, 0.0 }
 0x413   : > { %3413 = vpow2.f32 %v2557_v27  ;;  %v2508_v36 = vsub.f32 %v4143_v53, %v2440_v24  ;;  %2616 = vadd.xlane.f32.xlu0 %v2615_v32 }
 0x414   : > { %v4291_v51 = vpop.eup %3409  ;;  %3415 = vpow2.f32 %v2551_v46 }
 0x415   : > { %v2553_v48 = vmul.f32 1.442695, %v2508_v36  ;;  %v2618_v40 = vsel %vm2398_vm3, %v4291_v51, 0.0 }
 0x416   : > { %2619 = vadd.xlane.f32.xlu1 %v2618_v40 }
 0x417   : > { %3417 = vpow2.f32 %v2553_v48 }
 0x41a   : > { %v2455_v28 = vpop.xlane.xlu0 %2454 }
 0x41b   : > { %v2513_v26 = vsub.f32 %v4152_v58, %v2455_v28 }
 0x41c   : > { %v4296_v42 = vpop.eup %3411 }
 0x41d   : > { %v2563_v43 = vmul.f32 1.442695, %v2513_v26  ;;  %v2633_v45 = vsel %vm2398_vm3, %v4296_v42, 0.0 }
 0x41e   : > { %v2458_v53 = vpop.xlane.xlu1 %2457  ;;  %2634 = vadd.xlane.f32.xlu0 %v2633_v45  ;;  %v2449_v50 = vpop.xlane.xlu0 %2448 }
 0x41f   : > { %3419 = vpow2.f32 %v2563_v43  ;;  %v2514_v55 = vsub.f32 %v4160_v63, %v2458_v53  ;;  %v2511_v56 = vsub.f32 %v4155_v60, %v2449_v50 }
 0x420   : > { %v4302_v57 = vpop.eup %3413 }
 0x421   : > { %v4304_v30 = vpop.eup %3415  ;;  %v2565_v59 = vmul.f32 1.442695, %v2514_v55  ;;  %v2559_v58 = vmul.f32 1.442695, %v2511_v56  ;;  %v2636_v0 = vsel %vm2398_vm3, %v4302_v57, 0.0 }
 0x422   : > { %v2452_v33 = vpop.xlane.xlu1 %2451  ;;  %2637 = vadd.xlane.f32.xlu1 %v2636_v0  ;;  %v2627_v12 = vsel %vm2398_vm3, %v4304_v30, 0.0 }
 0x423   : > { %3421 = vpow2.f32 %v2565_v59  ;;  %v2512_v4 = vsub.f32 %v4163_v1, %v2452_v33  ;;  %2628 = vadd.xlane.f32.xlu0 %v2627_v12 }
 0x424   : > { %v4311_v63 = vpop.eup %3417  ;;  %3423 = vpow2.f32 %v2559_v58 }
 0x425   : > { %v2561_v60 = vmul.f32 1.442695, %v2512_v4  ;;  %v2630_v5 = vsel %vm2398_vm3, %v4311_v63, 0.0 }
 0x426   : > { %2631 = vadd.xlane.f32.xlu1 %v2630_v5 }
 0x427   : > { %3425 = vpow2.f32 %v2561_v60 }
 0x42a   : > { %v2467_v8 = vpop.xlane.xlu0 %2466 }
 0x42b   : > { %v2517_v35 = vsub.f32 %v4172_v10, %v2467_v8 }
 0x42c   : > { %v4316_v9 = vpop.eup %3419 }
 0x42d   : > { %v2571_v11 = vmul.f32 1.442695, %v2517_v35  ;;  %v2645_v14 = vsel %vm2398_vm3, %v4316_v9, 0.0 }
 0x42e   : > { %v2470_v1 = vpop.xlane.xlu1 %2469  ;;  %2646 = vadd.xlane.f32.xlu0 %v2645_v14  ;;  %v2461_v19 = vpop.xlane.xlu0 %2460 }
 0x42f   : > { %3427 = vpow2.f32 %v2571_v11  ;;  %v2518_v25 = vsub.f32 %v4180_v17, %v2470_v1  ;;  %v2515_v41 = vsub.f32 %v4175_v13, %v2461_v19 }
 0x430   : > { %v4322_v3 = vpop.eup %3421 }
 0x431   : > { %v4324_v15 = vpop.eup %3423  ;;  %v2573_v18 = vmul.f32 1.442695, %v2518_v25  ;;  %v2567_v10 = vmul.f32 1.442695, %v2515_v41  ;;  %v2648_v27 = vsel %vm2398_vm3, %v4322_v3, 0.0 }
 0x432   : > { %v2464_v46 = vpop.xlane.xlu1 %2463  ;;  %2649 = vadd.xlane.f32.xlu1 %v2648_v27  ;;  %v2639_v7 = vsel %vm2398_vm3, %v4324_v15, 0.0 }
 0x433   : > { %3429 = vpow2.f32 %v2573_v18  ;;  %v2516_v24 = vsub.f32 %v4183_v20, %v2464_v46  ;;  %2640 = vadd.xlane.f32.xlu0 %v2639_v7 }
 0x434   : > { %v4331_v17 = vpop.eup %3425  ;;  %3431 = vpow2.f32 %v2567_v10 }
 0x435   : > { %v2569_v13 = vmul.f32 1.442695, %v2516_v24  ;;  %v2642_v32 = vsel %vm2398_vm3, %v4331_v17, 0.0 }
 0x436   : > { %2643 = vadd.xlane.f32.xlu1 %v2642_v32 }
 0x437   : > { %3433 = vpow2.f32 %v2569_v13 }
 0x43a   : > { %v2479_v36 = vpop.xlane.xlu0 %2478 }
 0x43b   : > { %v2521_v48 = vsub.f32 %v4192_v37, %v2479_v36 }
 0x43c   : > { %v4336_v40 = vpop.eup %3427 }
 0x43d   : > { %v2579_v28 = vmul.f32 1.442695, %v2521_v48  ;;  %v2657_v26 = vsel %vm2398_vm3, %v4336_v40, 0.0 }
 0x43e   : > { %v2482_v20 = vpop.xlane.xlu1 %2481  ;;  %2658 = vadd.xlane.f32.xlu0 %v2657_v26  ;;  %v2473_v43 = vpop.xlane.xlu0 %2472 }
 0x43f   : > { %3435 = vpow2.f32 %v2579_v28  ;;  %v2522_v45 = vsub.f32 %v4200_v31, %v2482_v20  ;;  %v2519_v53 = vsub.f32 %v4195_v29, %v2473_v43 }
 0x440   : > { %v4342_v50 = vpop.eup %3429 }
 0x441   : > { %v4344_v55 = vpop.eup %3431  ;;  %v2581_v56 = vmul.f32 1.442695, %v2522_v45  ;;  %v2575_v37 = vmul.f32 1.442695, %v2519_v53  ;;  %v2660_v59 = vsel %vm2398_vm3, %v4342_v50, 0.0 }
 0x442   : > { %v2476_v58 = vpop.xlane.xlu1 %2475  ;;  %2661 = vadd.xlane.f32.xlu1 %v2660_v59  ;;  %v2651_v0 = vsel %vm2398_vm3, %v4344_v55, 0.0 }
 0x443   : > { %3437 = vpow2.f32 %v2581_v56  ;;  %v2520_v33 = vsub.f32 %v4203_v34, %v2476_v58  ;;  %2652 = vadd.xlane.f32.xlu0 %v2651_v0 }
 0x444   : > { %v4351_v31 = vpop.eup %3433  ;;  %3439 = vpow2.f32 %v2575_v37 }
 0x445   : > { %v2577_v29 = vmul.f32 1.442695, %v2520_v33  ;;  %v2654_v12 = vsel %vm2398_vm3, %v4351_v31, 0.0 }
 0x446   : > { %2655 = vadd.xlane.f32.xlu1 %v2654_v12 }
 0x447   : > { %3441 = vpow2.f32 %v2577_v29 }
 0x44c   : > { %v4355_v4 = vpop.eup %3435  ;;  %v2485_v60 = vpop.xlane.xlu0 %2484 }
 0x44d   : > { %v2523_v5 = vsub.f32 %v4212_v44, %v2485_v60  ;;  %v2669_v8 = vsel %vm2398_vm3, %v4355_v4, 0.0 }
 0x44e   : > { %2670 = vadd.xlane.f32.xlu0 %v2669_v8 }
 0x44f   : > { %v2583_v34 = vmul.f32 1.442695, %v2523_v5 }
 0x450   : > { %v4360_v35 = vpop.eup %3437  ;;  %v2488_v11 = vpop.xlane.xlu1 %2487 }
 0x451   : > { %v2491_v14 = vpop.xlane.xlu0 %2490  ;;  %v4362_v1 = vpop.eup %3439  ;;  %3443 = vpow2.f32 %v2583_v34  ;;  %v2524_v19 = vsub.f32 %v4220_v52, %v2488_v11  ;;  %v2672_v41 = vsel %vm2398_vm3, %v4360_v35, 0.0 }
 0x452   : > { %v2525_v25 = vsub.f32 %v4215_v47, %v2491_v14  ;;  %2673 = vadd.xlane.f32.xlu1 %v2672_v41  ;;  %v2663_v44 = vsel %vm2398_vm3, %v4362_v1, 0.0 }
 0x453   : > { %v2585_v18 = vmul.f32 1.442695, %v2524_v19  ;;  %2664 = vadd.xlane.f32.xlu0 %v2663_v44 }
 0x454   : > { %v2587_v10 = vmul.f32 1.442695, %v2525_v25  ;;  %v4370_v27 = vpop.eup %3441  ;;  %v2494_v46 = vpop.xlane.xlu1 %2493 }
 0x455   : > { %3445 = vpow2.f32 %v2585_v18  ;;  %v2526_v7 = vsub.f32 %v4223_v54, %v2494_v46  ;;  %v2666_v52 = vsel %vm2398_vm3, %v4370_v27, 0.0 }
 0x456   : > { %3447 = vpow2.f32 %v2587_v10  ;;  %2667 = vadd.xlane.f32.xlu1 %v2666_v52 }
 0x457   : > { %v2589_v47 = vmul.f32 1.442695, %v2526_v7 }
 0x459   : > { %3449 = vpow2.f32 %v2589_v47 }
 0x45e   : > { %v4375_v24 = vpop.eup %3443 }
 0x45f   : > { %v2675_v13 = vsel %vm2398_vm3, %v4375_v24, 0.0 }
 0x460   : > { %2676 = vadd.xlane.f32.xlu0 %v2675_v13 }
 0x462   : > { %v4379_v32 = vpop.eup %3445 }
 0x463   : > { %v4381_v36 = vpop.eup %3447  ;;  %v2678_v54 = vsel %vm2398_vm3, %v4379_v32, 0.0 }
 0x464   : > { %2679 = vadd.xlane.f32.xlu1 %v2678_v54  ;;  %v2681_v48 = vsel %vm2398_vm3, %v4381_v36, 0.0 }
 0x465   : > { %2682 = vadd.xlane.f32.xlu0 %v2681_v48 }
 0x466   : > { %v4387_v28 = vpop.eup %3449 }
 0x467   : > { %v2684_v26 = vsel %vm2398_vm3, %v4387_v28, 0.0 }
 0x468   : > { %2685 = vadd.xlane.f32.xlu1 %v2684_v26 }
 0x477   : > { %v2599_v20 = vpop.xlane.xlu0 %2598 }
 0x478   : > { %3451 = vrcp.f32 %v2599_v20 }
 0x47b   : > { %v2602_v43 = vpop.xlane.xlu1 %2601  ;;  %v2593_v45 = vpop.xlane.xlu0 %2592 }
 0x47c   : > { %3453 = vrcp.f32 %v2602_v43 }
 0x47d   : > { %3455 = vrcp.f32 %v2593_v45 }
 0x47f   : > { %v2596_v53 = vpop.xlane.xlu1 %2595 }
 0x480   : > { %3457 = vrcp.f32 %v2596_v53 }
 0x485   : > { %v3452_v56 = vpop.eup %3451 }
 0x486   : > { %v2692_v37 = vmul.f32 %v3452_v56, %v4236_v22 }
 0x487   : > { %v2611_v59 = vpop.xlane.xlu0 %2610 }
 0x488   : > { %2753 = vst.msk [vmem:[%s4395_s11 + $0x10] sm:$0xff] %vm2398_vm3, %v2692_v37  ;;  %3459 = vrcp.f32 %v2611_v59 }
 0x489   : > { %v3454_v58 = vpop.eup %3453 }
 0x48a   : > { %v3456_v0 = vpop.eup %3455  ;;  %v2694_v33 = vmul.f32 %v3454_v58, %v4244_v6 }
 0x48b   : > { %v2688_v29 = vmul.f32 %v3456_v0, %v4240_v23  ;;  %v2614_v12 = vpop.xlane.xlu1 %2613 }
 0x48c   : > { %2754 = vst.msk [vmem:[%s4395_s11 + $0x18] sm:$0xff] %vm2398_vm3, %v2694_v33  ;;  %3461 = vrcp.f32 %v2614_v12  ;;  %v2605_v60 = vpop.xlane.xlu0 %2604 }
 0x48d   : > { %v3458_v5 = vpop.eup %3457  ;;  %2751 = vst.msk [vmem:[%s4395_s11] sm:$0xff] %vm2398_vm3, %v2688_v29  ;;  %3463 = vrcp.f32 %v2605_v60 }
 0x48e   : > { %v2690_v22 = vmul.f32 %v3458_v5, %v4250_v38 }
 0x48f   : > { %v2608_v8 = vpop.xlane.xlu1 %2607 }
 0x490   : > { %2752 = vst.msk [vmem:[%s4395_s11 + $0x8] sm:$0xff] %vm2398_vm3, %v2690_v22  ;;  %3465 = vrcp.f32 %v2608_v8 }
 0x495   : > { %v3460_v6 = vpop.eup %3459 }
 0x496   : > { %v2700_v23 = vmul.f32 %v3460_v6, %v4256_v49 }
 0x497   : > { %v2623_v34 = vpop.xlane.xlu0 %2622 }
 0x498   : > { %2757 = vst.msk [vmem:[%s4395_s11 + $0x30] sm:$0xff] %vm2398_vm3, %v2700_v23  ;;  %3467 = vrcp.f32 %v2623_v34 }
 0x499   : > { %v3462_v11 = vpop.eup %3461 }
 0x49a   : > { %v3464_v14 = vpop.eup %3463  ;;  %v2702_v19 = vmul.f32 %v3462_v11, %v4262_v61 }
 0x49b   : > { %v2696_v38 = vmul.f32 %v3464_v14, %v4264_v62  ;;  %v2626_v25 = vpop.xlane.xlu1 %2625 }
 0x49c   : > { %2758 = vst.msk [vmem:[%s4395_s11 + $0x38] sm:$0xff] %vm2398_vm3, %v2702_v19  ;;  %3469 = vrcp.f32 %v2626_v25  ;;  %v2617_v41 = vpop.xlane.xlu0 %2616 }
 0x49d   : > { %v3466_v44 = vpop.eup %3465  ;;  %2755 = vst.msk [vmem:[%s4395_s11 + $0x20] sm:$0xff] %vm2398_vm3, %v2696_v38  ;;  %3471 = vrcp.f32 %v2617_v41 }
 0x49e   : > { %v2698_v49 = vmul.f32 %v3466_v44, %v4271_v39 }
 0x49f   : > { %v2620_v18 = vpop.xlane.xlu1 %2619 }
 0x4a0   : > { %2756 = vst.msk [vmem:[%s4395_s11 + $0x28] sm:$0xff] %vm2398_vm3, %v2698_v49  ;;  %3473 = vrcp.f32 %v2620_v18 }
 0x4a5   : > { %v3468_v61 = vpop.eup %3467 }
 0x4a6   : > { %v2708_v62 = vmul.f32 %v3468_v61, %v4276_v16 }
 0x4a7   : > { %v2635_v10 = vpop.xlane.xlu0 %2634 }
 0x4a8   : > { %2761 = vst.msk [vmem:[%s4395_s11 + $0x50] sm:$0xff] %vm2398_vm3, %v2708_v62  ;;  %3475 = vrcp.f32 %v2635_v10 }
 0x4a9   : > { %v3470_v46 = vpop.eup %3469 }
 0x4aa   : > { %v3472_v7 = vpop.eup %3471  ;;  %v2710_v52 = vmul.f32 %v3470_v46, %v4282_v2 }
 0x4ab   : > { %v2704_v39 = vmul.f32 %v3472_v7, %v4284_v21  ;;  %v2638_v47 = vpop.xlane.xlu1 %2637 }
 0x4ac   : > { %2762 = vst.msk [vmem:[%s4395_s11 + $0x58] sm:$0xff] %vm2398_vm3, %v2710_v52  ;;  %3477 = vrcp.f32 %v2638_v47  ;;  %v2629_v13 = vpop.xlane.xlu0 %2628 }
 0x4ad   : > { %v3474_v54 = vpop.eup %3473  ;;  %2759 = vst.msk [vmem:[%s4395_s11 + $0x40] sm:$0xff] %vm2398_vm3, %v2704_v39  ;;  %3479 = vrcp.f32 %v2629_v13 }
 0x4ae   : > { %v2706_v16 = vmul.f32 %v3474_v54, %v4291_v51 }
 0x4af   : > { %v2632_v48 = vpop.xlane.xlu1 %2631 }
 0x4b0   : > { %2760 = vst.msk [vmem:[%s4395_s11 + $0x48] sm:$0xff] %vm2398_vm3, %v2706_v16  ;;  %3481 = vrcp.f32 %v2632_v48 }
 0x4b5   : > { %v3476_v2 = vpop.eup %3475 }
 0x4b6   : > { %v2716_v21 = vmul.f32 %v3476_v2, %v4296_v42 }
 0x4b7   : > { %v2647_v26 = vpop.xlane.xlu0 %2646 }
 0x4b8   : > { %2765 = vst.msk [vmem:[%s4395_s11 + $0x70] sm:$0xff] %vm2398_vm3, %v2716_v21  ;;  %3483 = vrcp.f32 %v2647_v26 }
 0x4b9   : > { %v3478_v20 = vpop.eup %3477 }
 0x4ba   : > { %v3480_v43 = vpop.eup %3479  ;;  %v2718_v45 = vmul.f32 %v3478_v20, %v4302_v57 }
 0x4bb   : > { %v2712_v51 = vmul.f32 %v3480_v43, %v4304_v30  ;;  %v2650_v53 = vpop.xlane.xlu1 %2649 }
 0x4bc   : > { %2766 = vst.msk [vmem:[%s4395_s11 + $0x78] sm:$0xff] %vm2398_vm3, %v2718_v45  ;;  %3485 = vrcp.f32 %v2650_v53  ;;  %v2641_v56 = vpop.xlane.xlu0 %2640 }
 0x4bd   : > { %v3482_v37 = vpop.eup %3481  ;;  %2763 = vst.msk [vmem:[%s4395_s11 + $0x60] sm:$0xff] %vm2398_vm3, %v2712_v51  ;;  %3487 = vrcp.f32 %v2641_v56 }
 0x4be   : > { %v2714_v42 = vmul.f32 %v3482_v37, %v4311_v63 }
 0x4bf   : > { %v2644_v59 = vpop.xlane.xlu1 %2643 }
 0x4c0   : > { %2764 = vst.msk [vmem:[%s4395_s11 + $0x68] sm:$0xff] %vm2398_vm3, %v2714_v42  ;;  %3489 = vrcp.f32 %v2644_v59 }
 0x4c5   : > { %v3484_v57 = vpop.eup %3483 }
 0x4c6   : > { %v2724_v30 = vmul.f32 %v3484_v57, %v4316_v9 }
 0x4c7   : > { %v2659_v58 = vpop.xlane.xlu0 %2658 }
 0x4c8   : > { %2769 = vst.msk [vmem:[%s4395_s11 + $0x90] sm:$0xff] %vm2398_vm3, %v2724_v30  ;;  %3491 = vrcp.f32 %v2659_v58 }
 0x4c9   : > { %v3486_v0 = vpop.eup %3485 }
 0x4ca   : > { %v3488_v33 = vpop.eup %3487  ;;  %v2726_v29 = vmul.f32 %v3486_v0, %v4322_v3 }
 0x4cb   : > { %v2720_v63 = vmul.f32 %v3488_v33, %v4324_v15  ;;  %v2662_v12 = vpop.xlane.xlu1 %2661 }
 0x4cc   : > { %2770 = vst.msk [vmem:[%s4395_s11 + $0x98] sm:$0xff] %vm2398_vm3, %v2726_v29  ;;  %3493 = vrcp.f32 %v2662_v12  ;;  %v2653_v60 = vpop.xlane.xlu0 %2652 }
 0x4cd   : > { %v3490_v5 = vpop.eup %3489  ;;  %2767 = vst.msk [vmem:[%s4395_s11 + $0x80] sm:$0xff] %vm2398_vm3, %v2720_v63  ;;  %3495 = vrcp.f32 %v2653_v60 }
 0x4ce   : > { %v2722_v9 = vmul.f32 %v3490_v5, %v4331_v17 }
 0x4cf   : > { %v2656_v22 = vpop.xlane.xlu1 %2655 }
 0x4d0   : > { %2768 = vst.msk [vmem:[%s4395_s11 + $0x88] sm:$0xff] %vm2398_vm3, %v2722_v9  ;;  %3497 = vrcp.f32 %v2656_v22 }
 0x4d5   : > { %v3492_v3 = vpop.eup %3491 }
 0x4d6   : > { %v2732_v15 = vmul.f32 %v3492_v3, %v4336_v40 }
 0x4d7   : > { %v2671_v8 = vpop.xlane.xlu0 %2670 }
 0x4d8   : > { %2773 = vst.msk [vmem:[%s4395_s11 + $0xb0] sm:$0xff] %vm2398_vm3, %v2732_v15  ;;  %3499 = vrcp.f32 %v2671_v8 }
 0x4d9   : > { %v3494_v6 = vpop.eup %3493 }
 0x4da   : > { %v3496_v23 = vpop.eup %3495  ;;  %v2734_v34 = vmul.f32 %v3494_v6, %v4342_v50 }
 0x4db   : > { %v2728_v17 = vmul.f32 %v3496_v23, %v4344_v55  ;;  %v2674_v11 = vpop.xlane.xlu1 %2673 }
 0x4dc   : > { %2774 = vst.msk [vmem:[%s4395_s11 + $0xb8] sm:$0xff] %vm2398_vm3, %v2734_v34  ;;  %3501 = vrcp.f32 %v2674_v11  ;;  %v2665_v14 = vpop.xlane.xlu0 %2664 }
 0x4dd   : > { %v3498_v19 = vpop.eup %3497  ;;  %2771 = vst.msk [vmem:[%s4395_s11 + $0xa0] sm:$0xff] %vm2398_vm3, %v2728_v17  ;;  %3503 = vrcp.f32 %v2665_v14 }
 0x4de   : > { %v2730_v40 = vmul.f32 %v3498_v19, %v4351_v31 }
 0x4df   : > { %v2668_v38 = vpop.xlane.xlu1 %2667 }
 0x4e0   : > { %2772 = vst.msk [vmem:[%s4395_s11 + $0xa8] sm:$0xff] %vm2398_vm3, %v2730_v40  ;;  %3505 = vrcp.f32 %v2668_v38 }
 0x4e5   : > { %v3500_v50 = vpop.eup %3499 }
 0x4e6   : > { %v2740_v55 = vmul.f32 %v3500_v50, %v4355_v4 }
 0x4e8   : > { %2777 = vst.msk [vmem:[%s4395_s11 + $0xd0] sm:$0xff] %vm2398_vm3, %v2740_v55 }
 0x4e9   : > { %v3502_v25 = vpop.eup %3501  ;;  %v2677_v41 = vpop.xlane.xlu0 %2676 }
 0x4ea   : > { %v3504_v44 = vpop.eup %3503  ;;  %v2742_v49 = vmul.f32 %v3502_v25, %v4360_v35  ;;  %3507 = vrcp.f32 %v2677_v41 }
 0x4eb   : > { %v2736_v18 = vmul.f32 %v3504_v44, %v4362_v1 }
 0x4ec   : > { %2778 = vst.msk [vmem:[%s4395_s11 + $0xd8] sm:$0xff] %vm2398_vm3, %v2742_v49 }
 0x4ed   : > { %v3506_v31 = vpop.eup %3505  ;;  %2775 = vst.msk [vmem:[%s4395_s11 + $0xc0] sm:$0xff] %vm2398_vm3, %v2736_v18  ;;  %v2680_v61 = vpop.xlane.xlu1 %2679 }
 0x4ee   : > { %v2738_v4 = vmul.f32 %v3506_v31, %v4370_v27  ;;  %3509 = vrcp.f32 %v2680_v61  ;;  %v2683_v62 = vpop.xlane.xlu0 %2682 }
 0x4ef   : > { %3511 = vrcp.f32 %v2683_v62 }
 0x4f0   : > { %2776 = vst.msk [vmem:[%s4395_s11 + $0xc8] sm:$0xff] %vm2398_vm3, %v2738_v4 }
 0x4f1   : > { %v2686_v35 = vpop.xlane.xlu1 %2685 }
 0x4f2   : > { %3513 = vrcp.f32 %v2686_v35 }
 0x4f7   : > { %v3508_v10 = vpop.eup %3507 }
 0x4f8   : > { %v2744_v1 = vmul.f32 %v3508_v10, %v4375_v24 }
 0x4fa   : > { %2779 = vst.msk [vmem:[%s4395_s11 + $0xe0] sm:$0xff] %vm2398_vm3, %v2744_v1 }
 0x4fb   : > { %v3510_v46 = vpop.eup %3509 }
 0x4fc   : > { %v3512_v7 = vpop.eup %3511  ;;  %v2746_v52 = vmul.f32 %v3510_v46, %v4379_v32 }
 0x4fd   : > { %v2748_v27 = vmul.f32 %v3512_v7, %v4381_v36 }
 0x4fe   : > { %2780 = vst.msk [vmem:[%s4395_s11 + $0xe8] sm:$0xff] %vm2398_vm3, %v2746_v52 }
 0x4ff   : > { %v3514_v39 = vpop.eup %3513  ;;  %2781 = vst.msk [vmem:[%s4395_s11 + $0xf0] sm:$0xff] %vm2398_vm3, %v2748_v27 }
 0x500   : > { %v2750_v47 = vmul.f32 %v3514_v39, %v4387_v28 }
 0x502   : > { %2782 = vst.msk [vmem:[%s4395_s11 + $0xf8] sm:$0xff] %vm2398_vm3, %v2750_v47 }
 0x503 PF: > { %s19_s30 = sadd.s32 1, %s3521_s30  }
 0x504   : > { %p16_p4 = scmp.ge.s32.totalorder %s19_s30, 4  }
 0x506   :  { %18 = sbr.rel (!%p16_p4) target bundleno = 1 (0x1), region = 86 }

</bundles_post_ra>
